<compile_context>
chip_gen: v7x
topology: tpu7x:2x2x1
jax: 0.10.0
libtpu: 0.0.40
codegen_flags: <defaults>
</compile_context>

<pallas_src>
import functools

import jax
import jax.numpy as jnp
from jax.experimental import pallas as pl
from jax.experimental.pallas import tpu as pltpu

LANES = 128                   # lane-dense output width (pad channel dims to this)
NUM_CLASSES = 10
C1_OUT, C2_OUT = 6, 16
MATMUL_DTYPE = jnp.float32    # set to jnp.bfloat16 on v6e/v7x for ~2x less HBM traffic


def _round_up(n, m):
    return (n + m - 1) // m * m


# ----------------------------------------------------------------------------
# Pallas kernels
# ----------------------------------------------------------------------------
def conv_relu_pool_kernel(cols_ref, w_ref, b_ref, o_ref):
    """Fused conv-as-matmul + bias + ReLU + 2x2/2 max-pool.

    cols_ref: (4, TM, K)  -- im2col patches, grouped by pooling phase (dh, dw)
    w_ref:    (K, 128)    -- conv weight, Cout zero-padded to 128 lanes
    b_ref:    (1, 128)
    o_ref:    (TM, 128)   -- pooled ReLU(conv) rows=(b, hp, wp), lanes=Cout(pad)
    """
    w = w_ref[...]
    z = jnp.dot(cols_ref[0], w, preferred_element_type=jnp.float32)
    for p in range(1, 4):                      # static unroll over the 4 pool taps
        z = jnp.maximum(z, jnp.dot(cols_ref[p], w,
                                   preferred_element_type=jnp.float32))
    # max-pool commutes with the (monotone, tap-independent) bias + ReLU epilogue
    o_ref[...] = jnp.maximum(z + b_ref[...], 0.0)


def fc_tail_kernel(x_ref, w1_ref, b1_ref, w2_ref, b2_ref, w3_ref, b3_ref, o_ref,
                   *, num_classes):
    """Fused fc1+ReLU -> fc2+ReLU -> fc3 -> log_softmax, all lanes padded to 128."""
    h = jnp.dot(x_ref[...], w1_ref[...], preferred_element_type=jnp.float32)
    h = jnp.maximum(h + b1_ref[...], 0.0)
    h = jnp.dot(h.astype(w2_ref.dtype), w2_ref[...],
                preferred_element_type=jnp.float32)
    h = jnp.maximum(h + b2_ref[...], 0.0)
    z = jnp.dot(h.astype(w3_ref.dtype), w3_ref[...],
                preferred_element_type=jnp.float32)
    z = z + b3_ref[...]
    # mask padded class lanes out of the softmax reduction
    col = jax.lax.broadcasted_iota(jnp.int32, z.shape, dimension=1)
    z = jnp.where(col < num_classes, z, -1e30)
    m = jnp.max(z, axis=-1, keepdims=True)
    s = z - m
    lse = jnp.log(jnp.sum(jnp.exp(s), axis=-1, keepdims=True))
    o_ref[...] = s - lse


# ----------------------------------------------------------------------------
# Wrappers (XLA glue is layout-only)
# ----------------------------------------------------------------------------
def _phase_im2col(x, kh, kw):
    """x: (B,H,W,C) NHWC -> (4, B*Hp*Wp, kh*kw*C) patches grouped by 2x2 pool
    phase, so the fused kernel's pool is a 4-way max of 2-D matmul results."""
    B, H, W, C = x.shape
    Hp, Wp = (H - kh + 1) // 2, (W - kw + 1) // 2
    phases = []
    for dh in range(2):
        for dw in range(2):
            taps = []
            for i in range(kh):
                for j in range(kw):
                    a, b = dh + i, dw + j
                    t = x[:, a:a + 2 * Hp - 1:2, b:b + 2 * Wp - 1:2, :]
                    taps.append(t.reshape(B * Hp * Wp, C))
            phases.append(jnp.concatenate(taps, axis=-1))      # (R, kh*kw*C)
    return jnp.stack(phases, axis=0), (B, Hp, Wp)              # (4, R, K)


def conv_relu_pool(x, w_packed, b_packed, *, kh=3, kw=3, tm=512):
    """relu(conv2d(x, w) + b) followed by 2x2/2 max-pool, fused in one kernel.
    x: (B,H,W,Cin) NHWC. Returns (B*Hp*Wp, 128) rows=(b,hp,wp), lanes=Cout(pad)."""
    cols, (B, Hp, Wp) = _phase_im2col(x, kh, kw)
    cols = cols.astype(MATMUL_DTYPE)
    R, K = cols.shape[1], cols.shape[2]

    tm = min(tm, _round_up(R, 16))          # largest row tile <= 512 that tiles R
    R_pad = _round_up(R, tm)
    if R_pad != R:
        cols = jnp.pad(cols, ((0, 0), (0, R_pad - R), (0, 0)))

    out = pl.pallas_call(
        conv_relu_pool_kernel,
        out_shape=jax.ShapeDtypeStruct((R_pad, LANES), jnp.float32),
        grid_spec=pltpu.PrefetchScalarGridSpec(
            num_scalar_prefetch=0,
            grid=(R_pad // tm,),
            in_specs=[
                pl.BlockSpec((4, tm, K), lambda m: (0, m, 0)),
                pl.BlockSpec((K, LANES), lambda m: (0, 0)),
                pl.BlockSpec((1, LANES), lambda m: (0, 0)),
            ],
            out_specs=pl.BlockSpec((tm, LANES), lambda m: (m, 0)),
        ),
        compiler_params=pltpu.CompilerParams(
            dimension_semantics=("parallel",),       # megacore sharding on v7x
            vmem_limit_bytes=32 * 1024 * 1024,       # raise toward 128 MiB on v6e
        ),
    )(cols, w_packed, b_packed)
    return out[:R], (B, Hp, Wp)


def fc_tail(x, pk):
    """Fused fc1/fc2/fc3 + log_softmax. x: (B, 400). Returns (B, 10) log-probs."""
    B = x.shape[0]
    kernel = functools.partial(fc_tail_kernel, num_classes=NUM_CLASSES)
    out = pl.pallas_call(
        kernel,
        out_shape=jax.ShapeDtypeStruct((B, LANES), jnp.float32),
        in_specs=[pl.BlockSpec(memory_space=pltpu.MemorySpace.VMEM)
                  for _ in range(7)],
        out_specs=pl.BlockSpec(memory_space=pltpu.MemorySpace.VMEM),
        compiler_params=pltpu.CompilerParams(vmem_limit_bytes=32 * 1024 * 1024),
    )(x.astype(MATMUL_DTYPE),
      pk["fc1_w"], pk["fc1_b"], pk["fc2_w"], pk["fc2_b"], pk["fc3_w"], pk["fc3_b"])
    return out[:, :NUM_CLASSES]


# ----------------------------------------------------------------------------
# Parameters: torch-layout init, one-time packing into kernel-ready layout
# ----------------------------------------------------------------------------
def init_params(key):
    ks = jax.random.split(key, 10)
    u = lambda k, shape, s: jax.random.uniform(k, shape, jnp.float32, -s, s)
    return {
        "conv1_w": u(ks[0], (6, 1, 3, 3), (1 * 3 * 3) ** -0.5),
        "conv1_b": u(ks[1], (6,), (1 * 3 * 3) ** -0.5),
        "conv2_w": u(ks[2], (16, 6, 3, 3), (6 * 3 * 3) ** -0.5),
        "conv2_b": u(ks[3], (16,), (6 * 3 * 3) ** -0.5),
        "fc1_w": u(ks[4], (120, 400), 400 ** -0.5),
        "fc1_b": u(ks[5], (120,), 400 ** -0.5),
        "fc2_w": u(ks[6], (84, 120), 120 ** -0.5),
        "fc2_b": u(ks[7], (84,), 120 ** -0.5),
        "fc3_w": u(ks[8], (10, 84), 84 ** -0.5),
        "fc3_b": u(ks[9], (10,), 84 ** -0.5),
    }


def _pad_lanes(a, lanes=LANES):
    return jnp.pad(a, ((0, 0), (0, lanes - a.shape[-1])))


def pack_params(p):
    """One-time conversion of torch-layout params into kernel-ready layout:
    conv (Cout,Cin,kh,kw) -> (kh*kw*Cin, 128) matching im2col column order;
    fc (N,K) -> (K, 128); fc1 columns permuted (C,H,W)->(H,W,C) so activations
    stay NHWC; biases -> (1, 128) zero-padded (the final layer masks padding)."""
    def conv_pack(w):
        cout, cin, kh, kw = w.shape
        wk = jnp.transpose(w, (2, 3, 1, 0)).reshape(kh * kw * cin, cout)
        return _pad_lanes(wk).astype(MATMUL_DTYPE)

    fc1 = p["fc1_w"].reshape(120, 16, 5, 5).transpose(0, 2, 3, 1).reshape(120, 400)
    fc2 = jnp.pad(p["fc2_w"].T, ((0, LANES - 120), (0, LANES - 84)))
    fc3 = jnp.pad(p["fc3_w"].T, ((0, LANES - 84), (0, LANES - 10)))
    return {
        "conv1_w": conv_pack(p["conv1_w"]),
        "conv1_b": _pad_lanes(p["conv1_b"][None, :]),
        "conv2_w": conv_pack(p["conv2_w"]),
        "conv2_b": _pad_lanes(p["conv2_b"][None, :]),
        "fc1_w": _pad_lanes(fc1.T).astype(MATMUL_DTYPE),
        "fc1_b": _pad_lanes(p["fc1_b"][None, :]),
        "fc2_w": fc2.astype(MATMUL_DTYPE),
        "fc2_b": _pad_lanes(p["fc2_b"][None, :]),
        "fc3_w": fc3.astype(MATMUL_DTYPE),
        "fc3_b": _pad_lanes(p["fc3_b"][None, :]),
    }


# ----------------------------------------------------------------------------
# Forward pass (kernel path) and pure-XLA reference of the torch module
# ----------------------------------------------------------------------------
@jax.jit
def forward(pk, x):
    """x: (B, 1, 28, 28) NCHW float32 (torch layout). Returns (B, 10) log-probs."""
    x = jnp.transpose(x, (0, 2, 3, 1))                                   # NHWC
    h, (B, Hp, Wp) = conv_relu_pool(x, pk["conv1_w"], pk["conv1_b"])     # (B*13*13,128)
    h = h[:, :C1_OUT].reshape(B, Hp, Wp, C1_OUT)                         # (B,13,13,6)
    h, (B, Hp, Wp) = conv_relu_pool(h, pk["conv2_w"], pk["conv2_b"])     # (B*5*5,128)
    h = h[:, :C2_OUT].reshape(B, Hp * Wp * C2_OUT)                       # (B,400) (h,w,c)
    return fc_tail(h, pk)                                                # (B,10)


def reference_forward(p, x):
    """Pure-JAX/XLA implementation of the torch module, verbatim (NCHW)."""
    def conv(h, w, b):
        dn = jax.lax.conv_dimension_numbers(h.shape, w.shape,
                                            ("NCHW", "OIHW", "NCHW"))
        h = jax.lax.conv_general_dilated(h, w, (1, 1), "VALID",
                                         dimension_numbers=dn)
        return jax.nn.relu(h + b[None, :, None, None])

    def pool(h):
        return jax.lax.reduce_window(h, -jnp.inf, jax.lax.max,
                                     (1, 1, 2, 2), (1, 1, 2, 2), "VALID")

    h = pool(conv(x, p["conv1_w"], p["conv1_b"]))
    h = pool(conv(h, p["conv2_w"], p["conv2_b"]))
    h = h.reshape(h.shape[0], -1)                      # torch .view(-1, 5*5*16)
    h = jax.nn.relu(h @ p["fc1_w"].T + p["fc1_b"])
    h = jax.nn.relu(h @ p["fc2_w"].T + p["fc2_b"])
    z = h @ p["fc3_w"].T + p["fc3_b"]
    return jax.nn.log_softmax(z, axis=-1)


if __name__ == "__main__":
    key = jax.random.PRNGKey(0)
    pkey, xkey = jax.random.split(key)
    params = init_params(pkey)
    packed = pack_params(params)            # one-time weight packing (not per-step)
    # MNIST-shaped input: forward requires 28x28 so fc1 sees 5*5*16 = 400 features.
    x = jax.random.normal(xkey, (2, 1, 28, 28), dtype=jnp.float32)

    out = jax.block_until_ready(forward(packed, x))
    assert out.shape == (2, NUM_CLASSES), out.shape

    # log-softmax rows must exponentiate to ~1
    row_sums = jnp.exp(out).sum(axis=1)
    assert bool(jnp.all(jnp.abs(row_sums - 1.0) < 1e-4)), row_sums

    # numerical parity with a pure-XLA rendering of the torch module
    with jax.default_matmul_precision("highest"):
        ref = jax.block_until_ready(jax.jit(reference_forward)(params, x))
    assert bool(jnp.allclose(out, ref, atol=5e-2, rtol=5e-2)), \
        float(jnp.max(jnp.abs(out - ref)))

    print("KERNEL_OK")
</pallas_src>

<mosaic_0001>
module attributes {stable_mosaic.version = 11 : i64} {
  func.func @conv_relu_pool_kernel(%arg0: i32, %arg1: memref<4x352x9xf32, #tpu.memory_space<vmem>>, %arg2: memref<9x128xf32, #tpu.memory_space<vmem>>, %arg3: memref<1x128xf32, #tpu.memory_space<vmem>>, %arg4: memref<352x128xf32, #tpu.memory_space<vmem>>) attributes {dimension_semantics = [#tpu.dimension_semantics<parallel>], iteration_bounds = array<i64: 1>, scalar_prefetch = 0 : i64, scratch_operands = 0 : i64, tpu.core_type = #tpu.core_type<tc>, window_params = [{transform_indices = @transform_0, window_bounds = array<i64: 4, 352, 9>}, {pipeline_mode = #tpu.pipeline_mode<synchronous>, transform_indices = @transform_1, window_bounds = array<i64: 9, 128>}, {pipeline_mode = #tpu.pipeline_mode<synchronous>, transform_indices = @transform_2, window_bounds = array<i64: 1, 128>}, {transform_indices = @transform_3, window_bounds = array<i64: 352, 128>}]} {
    %c0 = arith.constant 0 : index
    %c0_0 = arith.constant 0 : index
    %0 = vector.load %arg2[%c0, %c0_0] : memref<9x128xf32, #tpu.memory_space<vmem>>, vector<9x128xf32>
    %c0_1 = arith.constant 0 : index
    %c0_2 = arith.constant 0 : index
    %c0_3 = arith.constant 0 : index
    %1 = vector.load %arg1[%c0_1, %c0_2, %c0_3] : memref<4x352x9xf32, #tpu.memory_space<vmem>>, vector<1x352x9xf32>
    %2 = vector.shape_cast %1 : vector<1x352x9xf32> to vector<352x9xf32>
    %cst = arith.constant dense<0.000000e+00> : vector<352x128xf32>
    %3 = tpu.matmul %2, %0, %cst {dimension_numbers = #tpu.dot_dimension_numbers<[1], [0], [0], [1], [0, 0, 1, 1], [], []>} : vector<352x9xf32>, vector<9x128xf32>, vector<352x128xf32> -> vector<352x128xf32>
    %c1 = arith.constant 1 : index
    %c0_4 = arith.constant 0 : index
    %c0_5 = arith.constant 0 : index
    %4 = vector.load %arg1[%c1, %c0_4, %c0_5] : memref<4x352x9xf32, #tpu.memory_space<vmem>>, vector<1x352x9xf32>
    %5 = vector.shape_cast %4 : vector<1x352x9xf32> to vector<352x9xf32>
    %cst_6 = arith.constant dense<0.000000e+00> : vector<352x128xf32>
    %6 = tpu.matmul %5, %0, %cst_6 {dimension_numbers = #tpu.dot_dimension_numbers<[1], [0], [0], [1], [0, 0, 1, 1], [], []>} : vector<352x9xf32>, vector<9x128xf32>, vector<352x128xf32> -> vector<352x128xf32>
    %7 = arith.maximumf %3, %6 : vector<352x128xf32>
    %c2 = arith.constant 2 : index
    %c0_7 = arith.constant 0 : index
    %c0_8 = arith.constant 0 : index
    %8 = vector.load %arg1[%c2, %c0_7, %c0_8] : memref<4x352x9xf32, #tpu.memory_space<vmem>>, vector<1x352x9xf32>
    %9 = vector.shape_cast %8 : vector<1x352x9xf32> to vector<352x9xf32>
    %cst_9 = arith.constant dense<0.000000e+00> : vector<352x128xf32>
    %10 = tpu.matmul %9, %0, %cst_9 {dimension_numbers = #tpu.dot_dimension_numbers<[1], [0], [0], [1], [0, 0, 1, 1], [], []>} : vector<352x9xf32>, vector<9x128xf32>, vector<352x128xf32> -> vector<352x128xf32>
    %11 = arith.maximumf %7, %10 : vector<352x128xf32>
    %c3 = arith.constant 3 : index
    %c0_10 = arith.constant 0 : index
    %c0_11 = arith.constant 0 : index
    %12 = vector.load %arg1[%c3, %c0_10, %c0_11] : memref<4x352x9xf32, #tpu.memory_space<vmem>>, vector<1x352x9xf32>
    %13 = vector.shape_cast %12 : vector<1x352x9xf32> to vector<352x9xf32>
    %cst_12 = arith.constant dense<0.000000e+00> : vector<352x128xf32>
    %14 = tpu.matmul %13, %0, %cst_12 {dimension_numbers = #tpu.dot_dimension_numbers<[1], [0], [0], [1], [0, 0, 1, 1], [], []>} : vector<352x9xf32>, vector<9x128xf32>, vector<352x128xf32> -> vector<352x128xf32>
    %15 = arith.maximumf %11, %14 : vector<352x128xf32>
    %c0_13 = arith.constant 0 : index
    %c0_14 = arith.constant 0 : index
    %16 = vector.load %arg3[%c0_13, %c0_14] : memref<1x128xf32, #tpu.memory_space<vmem>>, vector<1x128xf32>
    %17 = vector.broadcast %16 : vector<1x128xf32> to vector<352x128xf32>
    %18 = arith.addf %15, %17 : vector<352x128xf32>
    %cst_15 = arith.constant 0.000000e+00 : f32
    %19 = vector.broadcast %cst_15 : f32 to vector<352x128xf32>
    %20 = arith.maximumf %18, %19 : vector<352x128xf32>
    %c0_16 = arith.constant 0 : index
    %c0_17 = arith.constant 0 : index
    %21 = vector.load %arg4[%c0_16, %c0_17] : memref<352x128xf32, #tpu.memory_space<vmem>>, vector<352x128xf32>
    tpu.vector_store %arg4[%c0_16, %c0_17], %20 {strides = array<i32>} : memref<352x128xf32, #tpu.memory_space<vmem>>, vector<352x128xf32>,
    return
  }
  func.func @transform_0(%arg0: i32) -> (i32, i32, i32) {
    %c0_i32 = arith.constant 0 : i32
    %c0_i32_0 = arith.constant 0 : i32
    %c0_i32_1 = arith.constant 0 : i32
    return %c0_i32, %arg0, %c0_i32_0 : i32, i32, i32
  }
  func.func @transform_1(%arg0: i32) -> (i32, i32) {
    %c0_i32 = arith.constant 0 : i32
    %c0_i32_0 = arith.constant 0 : i32
    %c0_i32_1 = arith.constant 0 : i32
    return %c0_i32, %c0_i32_0 : i32, i32
  }
  func.func @transform_2(%arg0: i32) -> (i32, i32) {
    %c0_i32 = arith.constant 0 : i32
    %c0_i32_0 = arith.constant 0 : i32
    %c0_i32_1 = arith.constant 0 : i32
    return %c0_i32, %c0_i32_0 : i32, i32
  }
  func.func @transform_3(%arg0: i32) -> (i32, i32) {
    %c0_i32 = arith.constant 0 : i32
    %c0_i32_0 = arith.constant 0 : i32
    return %arg0, %c0_i32 : i32, i32
  }
}

module attributes {stable_mosaic.version = 11 : i64} {
  func.func @conv_relu_pool_kernel(%arg0: i32, %arg1: memref<4x64x54xf32, #tpu.memory_space<vmem>>, %arg2: memref<54x128xf32, #tpu.memory_space<vmem>>, %arg3: memref<1x128xf32, #tpu.memory_space<vmem>>, %arg4: memref<64x128xf32, #tpu.memory_space<vmem>>) attributes {dimension_semantics = [#tpu.dimension_semantics<parallel>], iteration_bounds = array<i64: 1>, scalar_prefetch = 0 : i64, scratch_operands = 0 : i64, tpu.core_type = #tpu.core_type<tc>, window_params = [{transform_indices = @transform_0, window_bounds = array<i64: 4, 64, 54>}, {pipeline_mode = #tpu.pipeline_mode<synchronous>, transform_indices = @transform_1, window_bounds = array<i64: 54, 128>}, {pipeline_mode = #tpu.pipeline_mode<synchronous>, transform_indices = @transform_2, window_bounds = array<i64: 1, 128>}, {transform_indices = @transform_3, window_bounds = array<i64: 64, 128>}]} {
    %c0 = arith.constant 0 : index
    %c0_0 = arith.constant 0 : index
    %0 = vector.load %arg2[%c0, %c0_0] : memref<54x128xf32, #tpu.memory_space<vmem>>, vector<54x128xf32>
    %c0_1 = arith.constant 0 : index
    %c0_2 = arith.constant 0 : index
    %c0_3 = arith.constant 0 : index
    %1 = vector.load %arg1[%c0_1, %c0_2, %c0_3] : memref<4x64x54xf32, #tpu.memory_space<vmem>>, vector<1x64x54xf32>
    %2 = vector.shape_cast %1 : vector<1x64x54xf32> to vector<64x54xf32>
    %cst = arith.constant dense<0.000000e+00> : vector<64x128xf32>
    %3 = tpu.matmul %2, %0, %cst {dimension_numbers = #tpu.dot_dimension_numbers<[1], [0], [0], [1], [0, 0, 1, 1], [], []>} : vector<64x54xf32>, vector<54x128xf32>, vector<64x128xf32> -> vector<64x128xf32>
    %c1 = arith.constant 1 : index
    %c0_4 = arith.constant 0 : index
    %c0_5 = arith.constant 0 : index
    %4 = vector.load %arg1[%c1, %c0_4, %c0_5] : memref<4x64x54xf32, #tpu.memory_space<vmem>>, vector<1x64x54xf32>
    %5 = vector.shape_cast %4 : vector<1x64x54xf32> to vector<64x54xf32>
    %cst_6 = arith.constant dense<0.000000e+00> : vector<64x128xf32>
    %6 = tpu.matmul %5, %0, %cst_6 {dimension_numbers = #tpu.dot_dimension_numbers<[1], [0], [0], [1], [0, 0, 1, 1], [], []>} : vector<64x54xf32>, vector<54x128xf32>, vector<64x128xf32> -> vector<64x128xf32>
    %7 = arith.maximumf %3, %6 : vector<64x128xf32>
    %c2 = arith.constant 2 : index
    %c0_7 = arith.constant 0 : index
    %c0_8 = arith.constant 0 : index
    %8 = vector.load %arg1[%c2, %c0_7, %c0_8] : memref<4x64x54xf32, #tpu.memory_space<vmem>>, vector<1x64x54xf32>
    %9 = vector.shape_cast %8 : vector<1x64x54xf32> to vector<64x54xf32>
    %cst_9 = arith.constant dense<0.000000e+00> : vector<64x128xf32>
    %10 = tpu.matmul %9, %0, %cst_9 {dimension_numbers = #tpu.dot_dimension_numbers<[1], [0], [0], [1], [0, 0, 1, 1], [], []>} : vector<64x54xf32>, vector<54x128xf32>, vector<64x128xf32> -> vector<64x128xf32>
    %11 = arith.maximumf %7, %10 : vector<64x128xf32>
    %c3 = arith.constant 3 : index
    %c0_10 = arith.constant 0 : index
    %c0_11 = arith.constant 0 : index
    %12 = vector.load %arg1[%c3, %c0_10, %c0_11] : memref<4x64x54xf32, #tpu.memory_space<vmem>>, vector<1x64x54xf32>
    %13 = vector.shape_cast %12 : vector<1x64x54xf32> to vector<64x54xf32>
    %cst_12 = arith.constant dense<0.000000e+00> : vector<64x128xf32>
    %14 = tpu.matmul %13, %0, %cst_12 {dimension_numbers = #tpu.dot_dimension_numbers<[1], [0], [0], [1], [0, 0, 1, 1], [], []>} : vector<64x54xf32>, vector<54x128xf32>, vector<64x128xf32> -> vector<64x128xf32>
    %15 = arith.maximumf %11, %14 : vector<64x128xf32>
    %c0_13 = arith.constant 0 : index
    %c0_14 = arith.constant 0 : index
    %16 = vector.load %arg3[%c0_13, %c0_14] : memref<1x128xf32, #tpu.memory_space<vmem>>, vector<1x128xf32>
    %17 = vector.broadcast %16 : vector<1x128xf32> to vector<64x128xf32>
    %18 = arith.addf %15, %17 : vector<64x128xf32>
    %cst_15 = arith.constant 0.000000e+00 : f32
    %19 = vector.broadcast %cst_15 : f32 to vector<64x128xf32>
    %20 = arith.maximumf %18, %19 : vector<64x128xf32>
    %c0_16 = arith.constant 0 : index
    %c0_17 = arith.constant 0 : index
    %21 = vector.load %arg4[%c0_16, %c0_17] : memref<64x128xf32, #tpu.memory_space<vmem>>, vector<64x128xf32>
    tpu.vector_store %arg4[%c0_16, %c0_17], %20 {strides = array<i32>} : memref<64x128xf32, #tpu.memory_space<vmem>>, vector<64x128xf32>,
    return
  }
  func.func @transform_0(%arg0: i32) -> (i32, i32, i32) {
    %c0_i32 = arith.constant 0 : i32
    %c0_i32_0 = arith.constant 0 : i32
    %c0_i32_1 = arith.constant 0 : i32
    return %c0_i32, %arg0, %c0_i32_0 : i32, i32, i32
  }
  func.func @transform_1(%arg0: i32) -> (i32, i32) {
    %c0_i32 = arith.constant 0 : i32
    %c0_i32_0 = arith.constant 0 : i32
    %c0_i32_1 = arith.constant 0 : i32
    return %c0_i32, %c0_i32_0 : i32, i32
  }
  func.func @transform_2(%arg0: i32) -> (i32, i32) {
    %c0_i32 = arith.constant 0 : i32
    %c0_i32_0 = arith.constant 0 : i32
    %c0_i32_1 = arith.constant 0 : i32
    return %c0_i32, %c0_i32_0 : i32, i32
  }
  func.func @transform_3(%arg0: i32) -> (i32, i32) {
    %c0_i32 = arith.constant 0 : i32
    %c0_i32_0 = arith.constant 0 : i32
    return %arg0, %c0_i32 : i32, i32
  }
}

module attributes {stable_mosaic.version = 11 : i64} {
  func.func @fc_tail_kernel(%arg0: memref<2x400xf32, #tpu.memory_space<vmem>>, %arg1: memref<400x128xf32, #tpu.memory_space<vmem>>, %arg2: memref<1x128xf32, #tpu.memory_space<vmem>>, %arg3: memref<128x128xf32, #tpu.memory_space<vmem>>, %arg4: memref<1x128xf32, #tpu.memory_space<vmem>>, %arg5: memref<128x128xf32, #tpu.memory_space<vmem>>, %arg6: memref<1x128xf32, #tpu.memory_space<vmem>>, %arg7: memref<2x128xf32, #tpu.memory_space<vmem>>) attributes {dimension_semantics = [], scalar_prefetch = 0 : i64, scratch_operands = 0 : i64, tpu.core_type = #tpu.core_type<tc>} {
    %c0 = arith.constant 0 : index
    %c0_0 = arith.constant 0 : index
    %0 = vector.load %arg0[%c0, %c0_0] : memref<2x400xf32, #tpu.memory_space<vmem>>, vector<2x400xf32>
    %c0_1 = arith.constant 0 : index
    %c0_2 = arith.constant 0 : index
    %1 = vector.load %arg1[%c0_1, %c0_2] : memref<400x128xf32, #tpu.memory_space<vmem>>, vector<400x128xf32>
    %cst = arith.constant dense<0.000000e+00> : vector<2x128xf32>
    %2 = tpu.matmul %0, %1, %cst {dimension_numbers = #tpu.dot_dimension_numbers<[1], [0], [0], [1], [0, 0, 1, 1], [], []>} : vector<2x400xf32>, vector<400x128xf32>, vector<2x128xf32> -> vector<2x128xf32>
    %c0_3 = arith.constant 0 : index
    %c0_4 = arith.constant 0 : index
    %3 = vector.load %arg2[%c0_3, %c0_4] : memref<1x128xf32, #tpu.memory_space<vmem>>, vector<1x128xf32>
    %4 = vector.broadcast %3 : vector<1x128xf32> to vector<2x128xf32>
    %5 = arith.addf %2, %4 : vector<2x128xf32>
    %cst_5 = arith.constant 0.000000e+00 : f32
    %6 = vector.broadcast %cst_5 : f32 to vector<2x128xf32>
    %7 = arith.maximumf %5, %6 : vector<2x128xf32>
    %c0_6 = arith.constant 0 : index
    %c0_7 = arith.constant 0 : index
    %8 = vector.load %arg3[%c0_6, %c0_7] : memref<128x128xf32, #tpu.memory_space<vmem>>, vector<128x128xf32>
    %cst_8 = arith.constant dense<0.000000e+00> : vector<2x128xf32>
    %9 = tpu.matmul %7, %8, %cst_8 {dimension_numbers = #tpu.dot_dimension_numbers<[1], [0], [0], [1], [0, 0, 1, 1], [], []>} : vector<2x128xf32>, vector<128x128xf32>, vector<2x128xf32> -> vector<2x128xf32>
    %c0_9 = arith.constant 0 : index
    %c0_10 = arith.constant 0 : index
    %10 = vector.load %arg4[%c0_9, %c0_10] : memref<1x128xf32, #tpu.memory_space<vmem>>, vector<1x128xf32>
    %11 = vector.broadcast %10 : vector<1x128xf32> to vector<2x128xf32>
    %12 = arith.addf %9, %11 : vector<2x128xf32>
    %cst_11 = arith.constant 0.000000e+00 : f32
    %13 = vector.broadcast %cst_11 : f32 to vector<2x128xf32>
    %14 = arith.maximumf %12, %13 : vector<2x128xf32>
    %c0_12 = arith.constant 0 : index
    %c0_13 = arith.constant 0 : index
    %15 = vector.load %arg5[%c0_12, %c0_13] : memref<128x128xf32, #tpu.memory_space<vmem>>, vector<128x128xf32>
    %cst_14 = arith.constant dense<0.000000e+00> : vector<2x128xf32>
    %16 = tpu.matmul %14, %15, %cst_14 {dimension_numbers = #tpu.dot_dimension_numbers<[1], [0], [0], [1], [0, 0, 1, 1], [], []>} : vector<2x128xf32>, vector<128x128xf32>, vector<2x128xf32> -> vector<2x128xf32>
    %c0_15 = arith.constant 0 : index
    %c0_16 = arith.constant 0 : index
    %17 = vector.load %arg6[%c0_15, %c0_16] : memref<1x128xf32, #tpu.memory_space<vmem>>, vector<1x128xf32>
    %18 = vector.broadcast %17 : vector<1x128xf32> to vector<2x128xf32>
    %19 = arith.addf %16, %18 : vector<2x128xf32>
    %20 = tpu.iota {dimensions = array<i32: 1>} : vector<2x128xi32>
    %c10_i32 = arith.constant 10 : i32
    %21 = vector.broadcast %c10_i32 : i32 to vector<2x128xi32>
    %22 = arith.cmpi slt, %20, %21 : vector<2x128xi32>
    %cst_17 = arith.constant -1.000000e+30 : f32
    %23 = vector.broadcast %cst_17 : f32 to vector<2x128xf32>
    %24 = arith.select %22, %19, %23 : vector<2x128xi1>, vector<2x128xf32>
    %cst_18 = arith.constant dense<0xFF800000> : vector<2xf32>
    %25 = vector.multi_reduction <maximumf>, %24, %cst_18 [1] : vector<2x128xf32> to vector<2xf32>
    %26 = vector.shape_cast %25 : vector<2xf32> to vector<2x1xf32>
    %27 = vector.broadcast %26 : vector<2x1xf32> to vector<2x128xf32>
    %28 = arith.subf %24, %27 : vector<2x128xf32>
    %29 = math.exp %28 : vector<2x128xf32>
    %cst_19 = arith.constant dense<0.000000e+00> : vector<2xf32>
    %30 = vector.multi_reduction <add>, %29, %cst_19 [1] : vector<2x128xf32> to vector<2xf32>
    %31 = vector.shape_cast %30 : vector<2xf32> to vector<2x1xf32>
    %32 = math.log %31 : vector<2x1xf32>
    %33 = vector.broadcast %32 : vector<2x1xf32> to vector<2x128xf32>
    %34 = arith.subf %28, %33 : vector<2x128xf32>
    %c0_20 = arith.constant 0 : index
    %c0_21 = arith.constant 0 : index
    %35 = vector.load %arg7[%c0_20, %c0_21] : memref<2x128xf32, #tpu.memory_space<vmem>>, vector<2x128xf32>
    tpu.vector_store %arg7[%c0_20, %c0_21], %34 {strides = array<i32>} : memref<2x128xf32, #tpu.memory_space<vmem>>, vector<2x128xf32>,
    return
  }
}

</mosaic_0001>

<bundles_post_ra>
// kernel: forward.3
= control target key start
LH: loop header
LB: loop body
LE: loop exit
PB: predicated region body
PF: predicated region fallthrough
CT: control target
= control target key end

     0   :  { %vm193_vm0 = vcmask 1040384   ;;  %vm60_vm1 = vcmask 72704   ;;  %vm2945_vm2 = vmmov 1   ;;  %s4273_s1 = inlined_call_operand.vmem [shape: f32[9,128], index: 1, kind: input, shape index: {}]   ;;  %s4274_s0 = inlined_call_operand.vmem [shape: f32[4,352,9], index: 0, kind: input, shape index: {}]   ;;  %s4275_s2 = inlined_call_operand.vmem [shape: f32[1,128], index: 2, kind: input, shape index: {}]   ;;  %s4276_s3 = inlined_call_operand.vmem [shape: f32[352,128], index: 3, kind: output, shape index: {}]  }
   0x1   :  { %v14_v0 = vld [vmem:[%s4273_s1] sm:$0xff]  ;;  %v15_v1 = vld [vmem:[%s4273_s1 + $0x8] sm:$0x1]  ;;  %vm2972_vm3 = vmpackc.low %vm193_vm0, %vm2945_vm2 }
   0x2   :  { %v2920_v3 = vpack.c.bf16 %v15_v1, %v14_v0  ;;  %v16_v4 = vld [vmem:[%s4274_s0] sm:$0xff]  ;;  %v17_v6 = vld [vmem:[%s4274_s0 + $0x8] sm:$0xff]  ;;  %v18_v8 = vld [vmem:[%s4274_s0 + $0x10] sm:$0xff] }
   0x3   :  { %v2188_v5 = vld [vmem:[%s4274_s0 + $0x160] sm:$0xff]  ;;  %2644 = vmatprep.mubr.msk.f32.mxu0 %vm60_vm1, %v16_v4  ;;  %v2189_v7 = vld [vmem:[%s4274_s0 + $0x168] sm:$0xff]  ;;  %v2190_v9 = vld [vmem:[%s4274_s0 + $0x170] sm:$0xff] }
   0x4   :  { %2714 = vmatprep.mubr.msk.f32.mxu1 %vm60_vm1, %v2188_v5  ;;  %2922 = vmatprep.subr.msk.bf16.mxu0 %vm2972_vm3, %v2920_v3  ;;  %v19_v10 = vld [vmem:[%s4274_s0 + $0x18] sm:$0xff]  ;;  %v20_v12 = vld [vmem:[%s4274_s0 + $0x20] sm:$0xff]  ;;  %v21_v14 = vld [vmem:[%s4274_s0 + $0x28] sm:$0xff] }
   0x5   :  { %2928 = vmatprep.subr.msk.bf16.mxu1 %vm2972_vm3, %v2920_v3  ;;  %2925 = vmatpush3.bf16.msk.msra.mxu0 %vm2972_vm3, %v2920_v3  ;;  %v2191_v11 = vld [vmem:[%s4274_s0 + $0x178] sm:$0xff]  ;;  %v2192_v13 = vld [vmem:[%s4274_s0 + $0x180] sm:$0xff]  ;;  %v2193_v15 = vld [vmem:[%s4274_s0 + $0x188] sm:$0xff] }
   0x6   :  { %2931 = vmatpush3.bf16.msk.msra.mxu1 %vm2972_vm3, %v2920_v3  ;;  %2934 = vmatprep.subr.msk.bf16.mxu0 %vm2972_vm3, %v2920_v3  ;;  %v22_v16 = vld [vmem:[%s4274_s0 + $0x30] sm:$0xff]  ;;  %v23_v18 = vld [vmem:[%s4274_s0 + $0x38] sm:$0xff]  ;;  %v24_v20 = vld [vmem:[%s4274_s0 + $0x40] sm:$0xff] }
   0x7   :  { %2940 = vmatprep.subr.msk.bf16.mxu1 %vm2972_vm3, %v2920_v3  ;;  %v2194_v17 = vld [vmem:[%s4274_s0 + $0x190] sm:$0xff]  ;;  %v2195_v19 = vld [vmem:[%s4274_s0 + $0x198] sm:$0xff]  ;;  %v2196_v21 = vld [vmem:[%s4274_s0 + $0x1a0] sm:$0xff] }
   0x8   :  { %2645 = vmatmul.mubr.msk.f32.vlgmr.msra.gmra.mrb[0].mxu0 %vm60_vm1, %v17_v6  ;;  %v25_v22 = vld [vmem:[%s4274_s0 + $0x48] sm:$0xff]  ;;  %v26_v24 = vld [vmem:[%s4274_s0 + $0x50] sm:$0xff]  ;;  %v27_v26 = vld [vmem:[%s4274_s0 + $0x58] sm:$0xff] }
   0x9   :  { %2715 = vmatmul.mubr.msk.f32.vlgmr.msra.gmra.mrb[0].mxu1 %vm60_vm1, %v2189_v7  ;;  %2937 = vmatpush3.bf16.msk.msra.mxu0 %vm2972_vm3, %v2920_v3  ;;  %v2197_v23 = vld [vmem:[%s4274_s0 + $0x1a8] sm:$0xff]  ;;  %v2198_v25 = vld [vmem:[%s4274_s0 + $0x1b0] sm:$0xff]  ;;  %v2199_v27 = vld [vmem:[%s4274_s0 + $0x1b8] sm:$0xff] }
   0xa   :  { %2647 = vmatprep.mubr.msk.f32.mxu0 %vm60_vm1, %v18_v8  ;;  %2717 = vmatprep.mubr.msk.f32.mxu1 %vm60_vm1, %v2190_v9  ;;  %v28_v28 = vld [vmem:[%s4274_s0 + $0x60] sm:$0xff]  ;;  %v29_v30 = vld [vmem:[%s4274_s0 + $0x68] sm:$0xff]  ;;  %v30_v32 = vld [vmem:[%s4274_s0 + $0x70] sm:$0xff] }
   0xb   :  { %2943 = vmatpush3.bf16.msk.msra.mxu1 %vm2972_vm3, %v2920_v3  ;;  %v2200_v29 = vld [vmem:[%s4274_s0 + $0x1c0] sm:$0xff]  ;;  %v2201_v31 = vld [vmem:[%s4274_s0 + $0x1c8] sm:$0xff]  ;;  %v2202_v33 = vld [vmem:[%s4274_s0 + $0x1d0] sm:$0xff] }
   0xc   :  { %2648 = vmatmul.mubr.msk.f32.gmra.mrb[2].mxu0 %vm60_vm1, %v19_v10  ;;  %v31_v34 = vld [vmem:[%s4274_s0 + $0x78] sm:$0xff]  ;;  %v32_v36 = vld [vmem:[%s4274_s0 + $0x80] sm:$0xff]  ;;  %v33_v38 = vld [vmem:[%s4274_s0 + $0x88] sm:$0xff] }
   0xd   :  { %2718 = vmatmul.mubr.msk.f32.gmra.mrb[2].mxu1 %vm60_vm1, %v2191_v11  ;;  %2650 = vmatprep.mubr.msk.f32.mxu0 %vm60_vm1, %v20_v12  ;;  %v2203_v35 = vld [vmem:[%s4274_s0 + $0x1d8] sm:$0xff]  ;;  %v2204_v37 = vld [vmem:[%s4274_s0 + $0x1e0] sm:$0xff]  ;;  %v2205_v39 = vld [vmem:[%s4274_s0 + $0x1e8] sm:$0xff] }
   0xe   :  { %2720 = vmatprep.mubr.msk.f32.mxu1 %vm60_vm1, %v2192_v13  ;;  %v34_v40 = vld [vmem:[%s4274_s0 + $0x90] sm:$0xff]  ;;  %v35_v42 = vld [vmem:[%s4274_s0 + $0x98] sm:$0xff]  ;;  %v36_v44 = vld [vmem:[%s4274_s0 + $0xa0] sm:$0xff] }
   0xf   :  { %v2206_v41 = vld [vmem:[%s4274_s0 + $0x1f0] sm:$0xff]  ;;  %v2207_v43 = vld [vmem:[%s4274_s0 + $0x1f8] sm:$0xff]  ;;  %v2208_v45 = vld [vmem:[%s4274_s0 + $0x200] sm:$0xff] }
  0x10   :  { %2651 = vmatmul.mubr.msk.f32.gmra.mrb[4].mxu0 %vm60_vm1, %v21_v14  ;;  %v37_v46 = vld [vmem:[%s4274_s0 + $0xa8] sm:$0xff]  ;;  %v38_v48 = vld [vmem:[%s4274_s0 + $0xb0] sm:$0xff]  ;;  %v39_v50 = vld [vmem:[%s4274_s0 + $0xb8] sm:$0xff] }
  0x11   :  { %2721 = vmatmul.mubr.msk.f32.gmra.mrb[4].mxu1 %vm60_vm1, %v2193_v15  ;;  %2653 = vmatprep.mubr.msk.f32.mxu0 %vm60_vm1, %v22_v16  ;;  %v2209_v47 = vld [vmem:[%s4274_s0 + $0x208] sm:$0xff]  ;;  %v2210_v49 = vld [vmem:[%s4274_s0 + $0x210] sm:$0xff]  ;;  %v2211_v51 = vld [vmem:[%s4274_s0 + $0x218] sm:$0xff] }
  0x12   :  { %2723 = vmatprep.mubr.msk.f32.mxu1 %vm60_vm1, %v2194_v17  ;;  %v40_v52 = vld [vmem:[%s4274_s0 + $0xc0] sm:$0xff]  ;;  %v41_v54 = vld [vmem:[%s4274_s0 + $0xc8] sm:$0xff]  ;;  %v42_v56 = vld [vmem:[%s4274_s0 + $0xd0] sm:$0xff] }
  0x13   :  { %v2212_v53 = vld [vmem:[%s4274_s0 + $0x220] sm:$0xff]  ;;  %v2213_v55 = vld [vmem:[%s4274_s0 + $0x228] sm:$0xff]  ;;  %v2214_v57 = vld [vmem:[%s4274_s0 + $0x230] sm:$0xff] }
  0x14   :  { %2654 = vmatmul.mubr.msk.f32.gmra.mrb[6].mxu0 %vm60_vm1, %v23_v18  ;;  %v43_v58 = vld [vmem:[%s4274_s0 + $0xd8] sm:$0xff]  ;;  %v44_v60 = vld [vmem:[%s4274_s0 + $0xe0] sm:$0xff]  ;;  %v45_v62 = vld [vmem:[%s4274_s0 + $0xe8] sm:$0xff] }
  0x15   :  { %2724 = vmatmul.mubr.msk.f32.gmra.mrb[6].mxu1 %vm60_vm1, %v2195_v19  ;;  %2656 = vmatprep.mubr.msk.f32.mxu0 %vm60_vm1, %v24_v20  ;;  %v2215_v59 = vld [vmem:[%s4274_s0 + $0x238] sm:$0xff]  ;;  %v2216_v61 = vld [vmem:[%s4274_s0 + $0x240] sm:$0xff]  ;;  %v2217_v63 = vld [vmem:[%s4274_s0 + $0x248] sm:$0xff] }
  0x16   :  { %2726 = vmatprep.mubr.msk.f32.mxu1 %vm60_vm1, %v2196_v21  ;;  %v46_v0 = vld [vmem:[%s4274_s0 + $0xf0] sm:$0xff]  ;;  %v47_v2 = vld [vmem:[%s4274_s0 + $0xf8] sm:$0xff]  ;;  %v48_v4 = vld [vmem:[%s4274_s0 + $0x100] sm:$0xff] }
  0x17   :  { %v2218_v1 = vld [vmem:[%s4274_s0 + $0x250] sm:$0xff]  ;;  %v2219_v3 = vld [vmem:[%s4274_s0 + $0x258] sm:$0xff]  ;;  %v2220_v5 = vld [vmem:[%s4274_s0 + $0x260] sm:$0xff] }
  0x18   :  { %2657 = vmatmul.mubr.msk.f32.gmra.mrb[8].mxu0 %vm60_vm1, %v25_v22  ;;  %v49_v6 = vld [vmem:[%s4274_s0 + $0x108] sm:$0xff]  ;;  %v50_v8 = vld [vmem:[%s4274_s0 + $0x110] sm:$0xff]  ;;  %v51_v10 = vld [vmem:[%s4274_s0 + $0x118] sm:$0xff] }
  0x19   :  { %2727 = vmatmul.mubr.msk.f32.gmra.mrb[8].mxu1 %vm60_vm1, %v2197_v23  ;;  %2659 = vmatprep.mubr.msk.f32.mxu0 %vm60_vm1, %v26_v24  ;;  %v2221_v7 = vld [vmem:[%s4274_s0 + $0x268] sm:$0xff]  ;;  %v2222_v9 = vld [vmem:[%s4274_s0 + $0x270] sm:$0xff]  ;;  %v2223_v11 = vld [vmem:[%s4274_s0 + $0x278] sm:$0xff] }
  0x1a   :  { %2729 = vmatprep.mubr.msk.f32.mxu1 %vm60_vm1, %v2198_v25  ;;  %v52_v12 = vld [vmem:[%s4274_s0 + $0x120] sm:$0xff]  ;;  %v53_v14 = vld [vmem:[%s4274_s0 + $0x128] sm:$0xff]  ;;  %v54_v16 = vld [vmem:[%s4274_s0 + $0x130] sm:$0xff] }
  0x1b   :  { %v2224_v13 = vld [vmem:[%s4274_s0 + $0x280] sm:$0xff]  ;;  %v2225_v15 = vld [vmem:[%s4274_s0 + $0x288] sm:$0xff]  ;;  %v2226_v17 = vld [vmem:[%s4274_s0 + $0x290] sm:$0xff] }
  0x1c   :  { %2660 = vmatmul.mubr.msk.f32.gmra.mrb[10].mxu0 %vm60_vm1, %v27_v26  ;;  %v55_v18 = vld [vmem:[%s4274_s0 + $0x138] sm:$0xff]  ;;  %v56_v20 = vld [vmem:[%s4274_s0 + $0x140] sm:$0xff]  ;;  %v57_v22 = vld [vmem:[%s4274_s0 + $0x148] sm:$0xff] }
  0x1d   :  { %2730 = vmatmul.mubr.msk.f32.gmra.mrb[10].mxu1 %vm60_vm1, %v2199_v27  ;;  %2662 = vmatprep.mubr.msk.f32.mxu0 %vm60_vm1, %v28_v28  ;;  %v2227_v19 = vld [vmem:[%s4274_s0 + $0x298] sm:$0xff]  ;;  %v2228_v21 = vld [vmem:[%s4274_s0 + $0x2a0] sm:$0xff]  ;;  %v2229_v23 = vld [vmem:[%s4274_s0 + $0x2a8] sm:$0xff] }
  0x1e   :  { %2732 = vmatprep.mubr.msk.f32.mxu1 %vm60_vm1, %v2200_v29  ;;  %v58_v24 = vld [vmem:[%s4274_s0 + $0x150] sm:$0xff]  ;;  %v59_v26 = vld [vmem:[%s4274_s0 + $0x158] sm:$0xff]  ;;  %v2277_v28 = vld [vmem:[%s4274_s0 + $0x2c0] sm:$0xff] }
  0x1f   :  { %v2230_v25 = vld [vmem:[%s4274_s0 + $0x2b0] sm:$0xff]  ;;  %v2231_v27 = vld [vmem:[%s4274_s0 + $0x2b8] sm:$0xff]  ;;  %v2366_v29 = vld [vmem:[%s4274_s0 + $0x420] sm:$0xff] }
  0x20   :  { %2663 = vmatmul.mubr.msk.f32.gmra.mrb[12].mxu0 %vm60_vm1, %v29_v30  ;;  %v2278_v30 = vld [vmem:[%s4274_s0 + $0x2c8] sm:$0xff] }
  0x21   :  { %2733 = vmatmul.mubr.msk.f32.gmra.mrb[12].mxu1 %vm60_vm1, %v2201_v31  ;;  %2665 = vmatprep.mubr.msk.f32.mxu0 %vm60_vm1, %v30_v32  ;;  %v2367_v31 = vld [vmem:[%s4274_s0 + $0x428] sm:$0xff]  ;;  %v2279_v32 = vld [vmem:[%s4274_s0 + $0x2d0] sm:$0xff] }
  0x22   :  { %2735 = vmatprep.mubr.msk.f32.mxu1 %vm60_vm1, %v2202_v33  ;;  %v2368_v33 = vld [vmem:[%s4274_s0 + $0x430] sm:$0xff] }
  0x24   :  { %2666 = vmatmul.mubr.msk.f32.gmra.mrb[14].mxu0 %vm60_vm1, %v31_v34  ;;  %v2280_v34 = vld [vmem:[%s4274_s0 + $0x2d8] sm:$0xff] }
  0x25   :  { %2736 = vmatmul.mubr.msk.f32.gmra.mrb[14].mxu1 %vm60_vm1, %v2203_v35  ;;  %2668 = vmatprep.mubr.msk.f32.mxu0 %vm60_vm1, %v32_v36  ;;  %v2369_v35 = vld [vmem:[%s4274_s0 + $0x438] sm:$0xff]  ;;  %v2281_v36 = vld [vmem:[%s4274_s0 + $0x2e0] sm:$0xff] }
  0x26   :  { %2738 = vmatprep.mubr.msk.f32.mxu1 %vm60_vm1, %v2204_v37  ;;  %v2370_v37 = vld [vmem:[%s4274_s0 + $0x440] sm:$0xff] }
  0x28   :  { %2669 = vmatmul.mubr.msk.f32.gmra.mrb[16].mxu0 %vm60_vm1, %v33_v38  ;;  %v2282_v38 = vld [vmem:[%s4274_s0 + $0x2e8] sm:$0xff] }
  0x29   :  { %2739 = vmatmul.mubr.msk.f32.gmra.mrb[16].mxu1 %vm60_vm1, %v2205_v39  ;;  %2671 = vmatprep.mubr.msk.f32.mxu0 %vm60_vm1, %v34_v40  ;;  %v2371_v39 = vld [vmem:[%s4274_s0 + $0x448] sm:$0xff]  ;;  %v2283_v40 = vld [vmem:[%s4274_s0 + $0x2f0] sm:$0xff] }
  0x2a   :  { %2741 = vmatprep.mubr.msk.f32.mxu1 %vm60_vm1, %v2206_v41  ;;  %v2372_v41 = vld [vmem:[%s4274_s0 + $0x450] sm:$0xff] }
  0x2c   :  { %2672 = vmatmul.mubr.msk.f32.gmra.mrb[18].mxu0 %vm60_vm1, %v35_v42  ;;  %v2284_v42 = vld [vmem:[%s4274_s0 + $0x2f8] sm:$0xff] }
  0x2d   :  { %2742 = vmatmul.mubr.msk.f32.gmra.mrb[18].mxu1 %vm60_vm1, %v2207_v43  ;;  %2674 = vmatprep.mubr.msk.f32.mxu0 %vm60_vm1, %v36_v44  ;;  %v2373_v43 = vld [vmem:[%s4274_s0 + $0x458] sm:$0xff]  ;;  %v2285_v44 = vld [vmem:[%s4274_s0 + $0x300] sm:$0xff] }
  0x2e   :  { %2744 = vmatprep.mubr.msk.f32.mxu1 %vm60_vm1, %v2208_v45  ;;  %v2374_v45 = vld [vmem:[%s4274_s0 + $0x460] sm:$0xff] }
  0x30   :  { %2675 = vmatmul.mubr.msk.f32.gmra.mrb[20].mxu0 %vm60_vm1, %v37_v46  ;;  %v2286_v46 = vld [vmem:[%s4274_s0 + $0x308] sm:$0xff] }
  0x31   :  { %2745 = vmatmul.mubr.msk.f32.gmra.mrb[20].mxu1 %vm60_vm1, %v2209_v47  ;;  %2677 = vmatprep.mubr.msk.f32.mxu0 %vm60_vm1, %v38_v48  ;;  %v2375_v47 = vld [vmem:[%s4274_s0 + $0x468] sm:$0xff]  ;;  %v2287_v48 = vld [vmem:[%s4274_s0 + $0x310] sm:$0xff] }
  0x32   :  { %2747 = vmatprep.mubr.msk.f32.mxu1 %vm60_vm1, %v2210_v49  ;;  %v2376_v49 = vld [vmem:[%s4274_s0 + $0x470] sm:$0xff] }
  0x34   :  { %2678 = vmatmul.mubr.msk.f32.gmra.mrb[22].mxu0 %vm60_vm1, %v39_v50  ;;  %v2288_v50 = vld [vmem:[%s4274_s0 + $0x318] sm:$0xff] }
  0x35   :  { %2748 = vmatmul.mubr.msk.f32.gmra.mrb[22].mxu1 %vm60_vm1, %v2211_v51  ;;  %2680 = vmatprep.mubr.msk.f32.mxu0 %vm60_vm1, %v40_v52  ;;  %v2377_v51 = vld [vmem:[%s4274_s0 + $0x478] sm:$0xff]  ;;  %v2289_v52 = vld [vmem:[%s4274_s0 + $0x320] sm:$0xff] }
  0x36   :  { %2750 = vmatprep.mubr.msk.f32.mxu1 %vm60_vm1, %v2212_v53  ;;  %v2378_v53 = vld [vmem:[%s4274_s0 + $0x480] sm:$0xff] }
  0x38   :  { %2681 = vmatmul.mubr.msk.f32.gmra.mrb[24].mxu0 %vm60_vm1, %v41_v54  ;;  %v2290_v54 = vld [vmem:[%s4274_s0 + $0x328] sm:$0xff] }
  0x39   :  { %2751 = vmatmul.mubr.msk.f32.gmra.mrb[24].mxu1 %vm60_vm1, %v2213_v55  ;;  %2683 = vmatprep.mubr.msk.f32.mxu0 %vm60_vm1, %v42_v56  ;;  %v2379_v55 = vld [vmem:[%s4274_s0 + $0x488] sm:$0xff]  ;;  %v2291_v56 = vld [vmem:[%s4274_s0 + $0x330] sm:$0xff] }
  0x3a   :  { %2753 = vmatprep.mubr.msk.f32.mxu1 %vm60_vm1, %v2214_v57  ;;  %v2380_v57 = vld [vmem:[%s4274_s0 + $0x490] sm:$0xff] }
  0x3c   :  { %2684 = vmatmul.mubr.msk.f32.gmra.mrb[26].mxu0 %vm60_vm1, %v43_v58  ;;  %v2292_v58 = vld [vmem:[%s4274_s0 + $0x338] sm:$0xff] }
  0x3d   :  { %2754 = vmatmul.mubr.msk.f32.gmra.mrb[26].mxu1 %vm60_vm1, %v2215_v59  ;;  %2686 = vmatprep.mubr.msk.f32.mxu0 %vm60_vm1, %v44_v60  ;;  %v2381_v59 = vld [vmem:[%s4274_s0 + $0x498] sm:$0xff]  ;;  %v2293_v60 = vld [vmem:[%s4274_s0 + $0x340] sm:$0xff] }
  0x3e   :  { %2756 = vmatprep.mubr.msk.f32.mxu1 %vm60_vm1, %v2216_v61  ;;  %v2382_v61 = vld [vmem:[%s4274_s0 + $0x4a0] sm:$0xff] }
  0x40   :  { %2687 = vmatmul.mubr.msk.f32.gmra.mrb[28].mxu0 %vm60_vm1, %v45_v62  ;;  %v2294_v62 = vld [vmem:[%s4274_s0 + $0x348] sm:$0xff] }
  0x41   :  { %2757 = vmatmul.mubr.msk.f32.gmra.mrb[28].mxu1 %vm60_vm1, %v2217_v63  ;;  %2689 = vmatprep.mubr.msk.f32.mxu0 %vm60_vm1, %v46_v0  ;;  %v2383_v63 = vld [vmem:[%s4274_s0 + $0x4a8] sm:$0xff]  ;;  %v2295_v0 = vld [vmem:[%s4274_s0 + $0x350] sm:$0xff] }
  0x42   :  { %2759 = vmatprep.mubr.msk.f32.mxu1 %vm60_vm1, %v2218_v1  ;;  %v2384_v1 = vld [vmem:[%s4274_s0 + $0x4b0] sm:$0xff] }
  0x44   :  { %2690 = vmatmul.mubr.msk.f32.gmra.mrb[30].mxu0 %vm60_vm1, %v47_v2  ;;  %v2296_v2 = vld [vmem:[%s4274_s0 + $0x358] sm:$0xff] }
  0x45   :  { %2760 = vmatmul.mubr.msk.f32.gmra.mrb[30].mxu1 %vm60_vm1, %v2219_v3  ;;  %2692 = vmatprep.mubr.msk.f32.mxu0 %vm60_vm1, %v48_v4  ;;  %v2385_v3 = vld [vmem:[%s4274_s0 + $0x4b8] sm:$0xff]  ;;  %v2297_v4 = vld [vmem:[%s4274_s0 + $0x360] sm:$0xff] }
  0x46   :  { %2762 = vmatprep.mubr.msk.f32.mxu1 %vm60_vm1, %v2220_v5  ;;  %v2386_v5 = vld [vmem:[%s4274_s0 + $0x4c0] sm:$0xff] }
  0x48   :  { %2693 = vmatmul.mubr.msk.f32.gmra.mrb[32].mxu0 %vm60_vm1, %v49_v6  ;;  %v2298_v6 = vld [vmem:[%s4274_s0 + $0x368] sm:$0xff] }
  0x49   :  { %2763 = vmatmul.mubr.msk.f32.gmra.mrb[32].mxu1 %vm60_vm1, %v2221_v7  ;;  %2695 = vmatprep.mubr.msk.f32.mxu0 %vm60_vm1, %v50_v8  ;;  %v2387_v7 = vld [vmem:[%s4274_s0 + $0x4c8] sm:$0xff]  ;;  %v2299_v8 = vld [vmem:[%s4274_s0 + $0x370] sm:$0xff] }
  0x4a   :  { %2765 = vmatprep.mubr.msk.f32.mxu1 %vm60_vm1, %v2222_v9  ;;  %v2388_v9 = vld [vmem:[%s4274_s0 + $0x4d0] sm:$0xff] }
  0x4c   :  { %2696 = vmatmul.mubr.msk.f32.gmra.mrb[34].mxu0 %vm60_vm1, %v51_v10  ;;  %v2300_v10 = vld [vmem:[%s4274_s0 + $0x378] sm:$0xff] }
  0x4d   :  { %2766 = vmatmul.mubr.msk.f32.gmra.mrb[34].mxu1 %vm60_vm1, %v2223_v11  ;;  %2698 = vmatprep.mubr.msk.f32.mxu0 %vm60_vm1, %v52_v12  ;;  %v2389_v11 = vld [vmem:[%s4274_s0 + $0x4d8] sm:$0xff]  ;;  %v2301_v12 = vld [vmem:[%s4274_s0 + $0x380] sm:$0xff] }
  0x4e   :  { %2768 = vmatprep.mubr.msk.f32.mxu1 %vm60_vm1, %v2224_v13  ;;  %v2390_v13 = vld [vmem:[%s4274_s0 + $0x4e0] sm:$0xff] }
  0x50   :  { %2699 = vmatmul.mubr.msk.f32.gmra.mrb[36].mxu0 %vm60_vm1, %v53_v14  ;;  %v2302_v14 = vld [vmem:[%s4274_s0 + $0x388] sm:$0xff] }
  0x51   :  { %2769 = vmatmul.mubr.msk.f32.gmra.mrb[36].mxu1 %vm60_vm1, %v2225_v15  ;;  %2701 = vmatprep.mubr.msk.f32.mxu0 %vm60_vm1, %v54_v16  ;;  %v2391_v15 = vld [vmem:[%s4274_s0 + $0x4e8] sm:$0xff]  ;;  %v2303_v16 = vld [vmem:[%s4274_s0 + $0x390] sm:$0xff] }
  0x52   :  { %2771 = vmatprep.mubr.msk.f32.mxu1 %vm60_vm1, %v2226_v17  ;;  %v2392_v17 = vld [vmem:[%s4274_s0 + $0x4f0] sm:$0xff] }
  0x54   :  { %2702 = vmatmul.mubr.msk.f32.gmra.mrb[38].mxu0 %vm60_vm1, %v55_v18  ;;  %v2304_v18 = vld [vmem:[%s4274_s0 + $0x398] sm:$0xff] }
  0x55   :  { %2772 = vmatmul.mubr.msk.f32.gmra.mrb[38].mxu1 %vm60_vm1, %v2227_v19  ;;  %2704 = vmatprep.mubr.msk.f32.mxu0 %vm60_vm1, %v56_v20  ;;  %v2393_v19 = vld [vmem:[%s4274_s0 + $0x4f8] sm:$0xff]  ;;  %v2305_v20 = vld [vmem:[%s4274_s0 + $0x3a0] sm:$0xff] }
  0x56   :  { %2774 = vmatprep.mubr.msk.f32.mxu1 %vm60_vm1, %v2228_v21  ;;  %v2394_v21 = vld [vmem:[%s4274_s0 + $0x500] sm:$0xff] }
  0x58   :  { %2705 = vmatmul.mubr.msk.f32.gmra.mrb[40].mxu0 %vm60_vm1, %v57_v22  ;;  %v2306_v22 = vld [vmem:[%s4274_s0 + $0x3a8] sm:$0xff] }
  0x59   :  { %2775 = vmatmul.mubr.msk.f32.gmra.mrb[40].mxu1 %vm60_vm1, %v2229_v23  ;;  %2707 = vmatprep.mubr.msk.f32.mxu0 %vm60_vm1, %v58_v24  ;;  %v2395_v23 = vld [vmem:[%s4274_s0 + $0x508] sm:$0xff]  ;;  %v2307_v24 = vld [vmem:[%s4274_s0 + $0x3b0] sm:$0xff] }
  0x5a   :  { %2777 = vmatprep.mubr.msk.f32.mxu1 %vm60_vm1, %v2230_v25  ;;  %v2396_v25 = vld [vmem:[%s4274_s0 + $0x510] sm:$0xff] }
  0x5c   :  { %2708 = vmatmul.mubr.msk.f32.gmra.mrb[42].mxu0 %vm60_vm1, %v59_v26  ;;  %v2308_v26 = vld [vmem:[%s4274_s0 + $0x3b8] sm:$0xff] }
  0x5d   :  { %2778 = vmatmul.mubr.msk.f32.gmra.mrb[42].mxu1 %vm60_vm1, %v2231_v27  ;;  %2784 = vmatprep.mubr.msk.f32.mxu0 %vm60_vm1, %v2277_v28  ;;  %v2397_v27 = vld [vmem:[%s4274_s0 + $0x518] sm:$0xff]  ;;  %v2309_v28 = vld [vmem:[%s4274_s0 + $0x3c0] sm:$0xff] }
  0x5e   :  { %2854 = vmatprep.mubr.msk.f32.mxu1 %vm60_vm1, %v2366_v29  ;;  %v2398_v29 = vld [vmem:[%s4274_s0 + $0x520] sm:$0xff] }
  0x60   :  { %2785 = vmatmul.mubr.msk.f32.vlgmr.msra.gmra.mrb[44].mxu0 %vm60_vm1, %v2278_v30  ;;  %v2310_v30 = vld [vmem:[%s4274_s0 + $0x3c8] sm:$0xff] }
  0x61   :  { %2855 = vmatmul.mubr.msk.f32.vlgmr.msra.gmra.mrb[44].mxu1 %vm60_vm1, %v2367_v31  ;;  %2787 = vmatprep.mubr.msk.f32.mxu0 %vm60_vm1, %v2279_v32  ;;  %v2399_v31 = vld [vmem:[%s4274_s0 + $0x528] sm:$0xff]  ;;  %v2311_v32 = vld [vmem:[%s4274_s0 + $0x3d0] sm:$0xff] }
  0x62   :  { %2857 = vmatprep.mubr.msk.f32.mxu1 %vm60_vm1, %v2368_v33  ;;  %v2400_v33 = vld [vmem:[%s4274_s0 + $0x530] sm:$0xff] }
  0x64   :  { %2788 = vmatmul.mubr.msk.f32.gmra.mrb[46].mxu0 %vm60_vm1, %v2280_v34  ;;  %v2312_v34 = vld [vmem:[%s4274_s0 + $0x3d8] sm:$0xff] }
  0x65   :  { %2858 = vmatmul.mubr.msk.f32.gmra.mrb[46].mxu1 %vm60_vm1, %v2369_v35  ;;  %2790 = vmatprep.mubr.msk.f32.mxu0 %vm60_vm1, %v2281_v36  ;;  %v2401_v35 = vld [vmem:[%s4274_s0 + $0x538] sm:$0xff]  ;;  %v2313_v36 = vld [vmem:[%s4274_s0 + $0x3e0] sm:$0xff] }
  0x66   :  { %2860 = vmatprep.mubr.msk.f32.mxu1 %vm60_vm1, %v2370_v37  ;;  %v2402_v37 = vld [vmem:[%s4274_s0 + $0x540] sm:$0xff] }
  0x68   :  { %2791 = vmatmul.mubr.msk.f32.gmra.mrb[48].mxu0 %vm60_vm1, %v2282_v38  ;;  %v2314_v38 = vld [vmem:[%s4274_s0 + $0x3e8] sm:$0xff] }
  0x69   :  { %2861 = vmatmul.mubr.msk.f32.gmra.mrb[48].mxu1 %vm60_vm1, %v2371_v39  ;;  %2793 = vmatprep.mubr.msk.f32.mxu0 %vm60_vm1, %v2283_v40  ;;  %v2403_v39 = vld [vmem:[%s4274_s0 + $0x548] sm:$0xff]  ;;  %v2315_v40 = vld [vmem:[%s4274_s0 + $0x3f0] sm:$0xff] }
  0x6a   :  { %2863 = vmatprep.mubr.msk.f32.mxu1 %vm60_vm1, %v2372_v41  ;;  %v2404_v41 = vld [vmem:[%s4274_s0 + $0x550] sm:$0xff] }
  0x6c   :  { %2794 = vmatmul.mubr.msk.f32.gmra.mrb[50].mxu0 %vm60_vm1, %v2284_v42  ;;  %v2316_v42 = vld [vmem:[%s4274_s0 + $0x3f8] sm:$0xff] }
  0x6d   :  { %2864 = vmatmul.mubr.msk.f32.gmra.mrb[50].mxu1 %vm60_vm1, %v2373_v43  ;;  %2796 = vmatprep.mubr.msk.f32.mxu0 %vm60_vm1, %v2285_v44  ;;  %v2405_v43 = vld [vmem:[%s4274_s0 + $0x558] sm:$0xff]  ;;  %v2317_v44 = vld [vmem:[%s4274_s0 + $0x400] sm:$0xff] }
  0x6e   :  { %2866 = vmatprep.mubr.msk.f32.mxu1 %vm60_vm1, %v2374_v45  ;;  %v2406_v45 = vld [vmem:[%s4274_s0 + $0x560] sm:$0xff] }
  0x70   :  { %2797 = vmatmul.mubr.msk.f32.gmra.mrb[52].mxu0 %vm60_vm1, %v2286_v46  ;;  %v2318_v46 = vld [vmem:[%s4274_s0 + $0x408] sm:$0xff] }
  0x71   :  { %2867 = vmatmul.mubr.msk.f32.gmra.mrb[52].mxu1 %vm60_vm1, %v2375_v47  ;;  %2799 = vmatprep.mubr.msk.f32.mxu0 %vm60_vm1, %v2287_v48  ;;  %v2407_v47 = vld [vmem:[%s4274_s0 + $0x568] sm:$0xff]  ;;  %v2319_v48 = vld [vmem:[%s4274_s0 + $0x410] sm:$0xff] }
  0x72   :  { %2869 = vmatprep.mubr.msk.f32.mxu1 %vm60_vm1, %v2376_v49  ;;  %v2408_v49 = vld [vmem:[%s4274_s0 + $0x570] sm:$0xff] }
  0x74   :  { %2800 = vmatmul.mubr.msk.f32.gmra.mrb[54].mxu0 %vm60_vm1, %v2288_v50  ;;  %v2320_v50 = vld [vmem:[%s4274_s0 + $0x418] sm:$0xff] }
  0x75   :  { %2870 = vmatmul.mubr.msk.f32.gmra.mrb[54].mxu1 %vm60_vm1, %v2377_v51  ;;  %2802 = vmatprep.mubr.msk.f32.mxu0 %vm60_vm1, %v2289_v52  ;;  %v2409_v51 = vld [vmem:[%s4274_s0 + $0x578] sm:$0xff] }
  0x76   :  { %2872 = vmatprep.mubr.msk.f32.mxu1 %vm60_vm1, %v2378_v53 }
  0x78   :  { %2803 = vmatmul.mubr.msk.f32.gmra.mrb[56].mxu0 %vm60_vm1, %v2290_v54 }
  0x79   :  { %2873 = vmatmul.mubr.msk.f32.gmra.mrb[56].mxu1 %vm60_vm1, %v2379_v55  ;;  %2805 = vmatprep.mubr.msk.f32.mxu0 %vm60_vm1, %v2291_v56 }
  0x7a   :  { %2875 = vmatprep.mubr.msk.f32.mxu1 %vm60_vm1, %v2380_v57 }
  0x7c   :  { %2806 = vmatmul.mubr.msk.f32.gmra.mrb[58].mxu0 %vm60_vm1, %v2292_v58 }
  0x7d   :  { %2876 = vmatmul.mubr.msk.f32.gmra.mrb[58].mxu1 %vm60_vm1, %v2381_v59  ;;  %2808 = vmatprep.mubr.msk.f32.mxu0 %vm60_vm1, %v2293_v60 }
  0x7e   :  { %2878 = vmatprep.mubr.msk.f32.mxu1 %vm60_vm1, %v2382_v61 }
  0x80   :  { %2809 = vmatmul.mubr.msk.f32.gmra.mrb[60].mxu0 %vm60_vm1, %v2294_v62 }
  0x81   :  { %2879 = vmatmul.mubr.msk.f32.gmra.mrb[60].mxu1 %vm60_vm1, %v2383_v63  ;;  %2811 = vmatprep.mubr.msk.f32.mxu0 %vm60_vm1, %v2295_v0 }
  0x82   :  { %2881 = vmatprep.mubr.msk.f32.mxu1 %vm60_vm1, %v2384_v1 }
  0x84   :  { %2812 = vmatmul.mubr.msk.f32.gmra.mrb[62].mxu0 %vm60_vm1, %v2296_v2 }
  0x85   :  { %2882 = vmatmul.mubr.msk.f32.gmra.mrb[62].mxu1 %vm60_vm1, %v2385_v3  ;;  %2814 = vmatprep.mubr.msk.f32.mxu0 %vm60_vm1, %v2297_v4 }
  0x86   :  { %2884 = vmatprep.mubr.msk.f32.mxu1 %vm60_vm1, %v2386_v5 }
  0x88   :  { %2815 = vmatmul.mubr.msk.f32.gmra.mrb[64].mxu0 %vm60_vm1, %v2298_v6 }
  0x89   :  { %2885 = vmatmul.mubr.msk.f32.gmra.mrb[64].mxu1 %vm60_vm1, %v2387_v7  ;;  %2817 = vmatprep.mubr.msk.f32.mxu0 %vm60_vm1, %v2299_v8 }
  0x8a   :  { %2887 = vmatprep.mubr.msk.f32.mxu1 %vm60_vm1, %v2388_v9 }
  0x8c   :  { %2818 = vmatmul.mubr.msk.f32.gmra.mrb[66].mxu0 %vm60_vm1, %v2300_v10 }
  0x8d   :  { %2888 = vmatmul.mubr.msk.f32.gmra.mrb[66].mxu1 %vm60_vm1, %v2389_v11  ;;  %2820 = vmatprep.mubr.msk.f32.mxu0 %vm60_vm1, %v2301_v12 }
  0x8e   :  { %2890 = vmatprep.mubr.msk.f32.mxu1 %vm60_vm1, %v2390_v13 }
  0x90   :  { %2821 = vmatmul.mubr.msk.f32.gmra.mrb[68].mxu0 %vm60_vm1, %v2302_v14 }
  0x91   :  { %2891 = vmatmul.mubr.msk.f32.gmra.mrb[68].mxu1 %vm60_vm1, %v2391_v15  ;;  %2823 = vmatprep.mubr.msk.f32.mxu0 %vm60_vm1, %v2303_v16 }
  0x92   :  { %2893 = vmatprep.mubr.msk.f32.mxu1 %vm60_vm1, %v2392_v17 }
  0x94   :  { %2824 = vmatmul.mubr.msk.f32.gmra.mrb[70].mxu0 %vm60_vm1, %v2304_v18 }
  0x95   :  { %2894 = vmatmul.mubr.msk.f32.gmra.mrb[70].mxu1 %vm60_vm1, %v2393_v19  ;;  %2826 = vmatprep.mubr.msk.f32.mxu0 %vm60_vm1, %v2305_v20 }
  0x96   :  { %2896 = vmatprep.mubr.msk.f32.mxu1 %vm60_vm1, %v2394_v21 }
  0x98   :  { %2827 = vmatmul.mubr.msk.f32.gmra.mrb[72].mxu0 %vm60_vm1, %v2306_v22 }
  0x99   :  { %2897 = vmatmul.mubr.msk.f32.gmra.mrb[72].mxu1 %vm60_vm1, %v2395_v23  ;;  %2829 = vmatprep.mubr.msk.f32.mxu0 %vm60_vm1, %v2307_v24 }
  0x9a   :  { %2899 = vmatprep.mubr.msk.f32.mxu1 %vm60_vm1, %v2396_v25 }
  0x9c   :  { %2830 = vmatmul.mubr.msk.f32.gmra.mrb[74].mxu0 %vm60_vm1, %v2308_v26 }
  0x9d   :  { %2900 = vmatmul.mubr.msk.f32.gmra.mrb[74].mxu1 %vm60_vm1, %v2397_v27  ;;  %2832 = vmatprep.mubr.msk.f32.mxu0 %vm60_vm1, %v2309_v28 }
  0x9e   :  { %2902 = vmatprep.mubr.msk.f32.mxu1 %vm60_vm1, %v2398_v29 }
  0xa0   :  { %2833 = vmatmul.mubr.msk.f32.gmra.mrb[76].mxu0 %vm60_vm1, %v2310_v30 }
  0xa1   :  { %2903 = vmatmul.mubr.msk.f32.gmra.mrb[76].mxu1 %vm60_vm1, %v2399_v31  ;;  %2835 = vmatprep.mubr.msk.f32.mxu0 %vm60_vm1, %v2311_v32 }
  0xa2   :  { %2905 = vmatprep.mubr.msk.f32.mxu1 %vm60_vm1, %v2400_v33 }
  0xa4   :  { %2836 = vmatmul.mubr.msk.f32.gmra.mrb[78].mxu0 %vm60_vm1, %v2312_v34 }
  0xa5   :  { %2906 = vmatmul.mubr.msk.f32.gmra.mrb[78].mxu1 %vm60_vm1, %v2401_v35  ;;  %2838 = vmatprep.mubr.msk.f32.mxu0 %vm60_vm1, %v2313_v36 }
  0xa6   :  { %2908 = vmatprep.mubr.msk.f32.mxu1 %vm60_vm1, %v2402_v37 }
  0xa8   :  { %2839 = vmatmul.mubr.msk.f32.gmra.mrb[80].mxu0 %vm60_vm1, %v2314_v38 }
  0xa9   :  { %2909 = vmatmul.mubr.msk.f32.gmra.mrb[80].mxu1 %vm60_vm1, %v2403_v39  ;;  %2841 = vmatprep.mubr.msk.f32.mxu0 %vm60_vm1, %v2315_v40 }
  0xaa   :  { %2911 = vmatprep.mubr.msk.f32.mxu1 %vm60_vm1, %v2404_v41 }
  0xac   :  { %2842 = vmatmul.mubr.msk.f32.gmra.mrb[82].mxu0 %vm60_vm1, %v2316_v42 }
  0xad   :  { %2912 = vmatmul.mubr.msk.f32.gmra.mrb[82].mxu1 %vm60_vm1, %v2405_v43  ;;  %2844 = vmatprep.mubr.msk.f32.mxu0 %vm60_vm1, %v2317_v44  ;;  %v3969_v44 = vld [vmem:[%s4275_s2] ss:$0 sm:$0xff] }
  0xae   :  { %2914 = vmatprep.mubr.msk.f32.mxu1 %vm60_vm1, %v2406_v45 }
  0xb0   :  { %2845 = vmatmul.mubr.msk.f32.gmra.mrb[84].mxu0 %vm60_vm1, %v2318_v46 }
  0xb1   :  { %2915 = vmatmul.mubr.msk.f32.gmra.mrb[84].mxu1 %vm60_vm1, %v2407_v47  ;;  %2847 = vmatprep.mubr.msk.f32.mxu0 %vm60_vm1, %v2319_v48 }
  0xb2   :  { %2917 = vmatprep.mubr.msk.f32.mxu1 %vm60_vm1, %v2408_v49 }
  0xb4   :  { %2848 = vmatmul.mubr.msk.f32.gmra.mrb[86].mxu0 %vm60_vm1, %v2320_v50 }
  0xb5   :  { %2918 = vmatmul.mubr.msk.f32.gmra.mrb[86].mxu1 %vm60_vm1, %v2409_v51 }
  0xdb   :  { %v3696_v52 = vpop.f32.mrb[0].mxu0 }
  0xdc   :  { %v3698_v53 = vpop.f32.mrb[0].mxu1  ;;  %v3702_v55 = vpop.f32.mrb[1].mxu0 }
  0xdd   :  { %v3704_v56 = vpop.f32.mrb[1].mxu1 }
  0xdf   :  { %v3708_v58 = vpop.f32.mrb[2].mxu0 }
  0xe0   :  { %v3710_v59 = vpop.f32.mrb[2].mxu1  ;;  %v3714_v61 = vpop.f32.mrb[3].mxu0 }
  0xe1   :  { %v3716_v62 = vpop.f32.mrb[3].mxu1 }
  0xe3   :  { %v3720_v0 = vpop.f32.mrb[4].mxu0 }
  0xe4   :  { %v3722_v1 = vpop.f32.mrb[4].mxu1  ;;  %v3726_v3 = vpop.f32.mrb[5].mxu0 }
  0xe5   :  { %v3728_v4 = vpop.f32.mrb[5].mxu1 }
  0xe7   :  { %v3732_v6 = vpop.f32.mrb[6].mxu0 }
  0xe8   :  { %v3734_v7 = vpop.f32.mrb[6].mxu1  ;;  %v3738_v9 = vpop.f32.mrb[7].mxu0 }
  0xe9   :  { %v3740_v10 = vpop.f32.mrb[7].mxu1 }
  0xeb   :  { %v3744_v12 = vpop.f32.mrb[8].mxu0 }
  0xec   :  { %v3746_v13 = vpop.f32.mrb[8].mxu1  ;;  %v3750_v15 = vpop.f32.mrb[9].mxu0 }
  0xed   :  { %v3752_v16 = vpop.f32.mrb[9].mxu1 }
  0xef   :  { %v3756_v18 = vpop.f32.mrb[10].mxu0 }
  0xf0   :  { %v3758_v19 = vpop.f32.mrb[10].mxu1  ;;  %v3762_v21 = vpop.f32.mrb[11].mxu0 }
  0xf1   :  { %v3764_v22 = vpop.f32.mrb[11].mxu1 }
  0xf3   :  { %v3768_v24 = vpop.f32.mrb[12].mxu0 }
  0xf4   :  { %v3770_v25 = vpop.f32.mrb[12].mxu1  ;;  %v3774_v27 = vpop.f32.mrb[13].mxu0 }
  0xf5   :  { %v3776_v28 = vpop.f32.mrb[13].mxu1 }
  0xf7   :  { %v3780_v30 = vpop.f32.mrb[14].mxu0 }
  0xf8   :  { %v3782_v31 = vpop.f32.mrb[14].mxu1  ;;  %v3786_v33 = vpop.f32.mrb[15].mxu0 }
  0xf9   :  { %v3788_v34 = vpop.f32.mrb[15].mxu1 }
  0xfb   :  { %v3792_v36 = vpop.f32.mrb[16].mxu0 }
  0xfc   :  { %v3794_v37 = vpop.f32.mrb[16].mxu1  ;;  %v3798_v39 = vpop.f32.mrb[17].mxu0 }
  0xfd   :  { %v3800_v40 = vpop.f32.mrb[17].mxu1 }
  0xff   :  { %v3804_v42 = vpop.f32.mrb[18].mxu0 }
 0x100   :  { %v3806_v43 = vpop.f32.mrb[18].mxu1  ;;  %v3810_v45 = vpop.f32.mrb[19].mxu0 }
 0x101   :  { %v3812_v46 = vpop.f32.mrb[19].mxu1 }
 0x103   :  { %v3816_v48 = vpop.f32.mrb[20].mxu0 }
 0x104   :  { %v3818_v49 = vpop.f32.mrb[20].mxu1  ;;  %v3822_v51 = vpop.f32.mrb[21].mxu0 }
 0x105   :  { %v3824_v41 = vpop.f32.mrb[21].mxu1 }
 0x107   :  { %v3828_v38 = vpop.f32.mrb[22].mxu0 }
 0x108   :  { %v3830_v35 = vpop.f32.mrb[22].mxu1  ;;  %v3834_v32 = vpop.f32.mrb[23].mxu0 }
 0x109   :  { %v3836_v29 = vpop.f32.mrb[23].mxu1 }
 0x10b   :  { %v3840_v26 = vpop.f32.mrb[24].mxu0 }
 0x10c   :  { %v3842_v23 = vpop.f32.mrb[24].mxu1  ;;  %v3846_v20 = vpop.f32.mrb[25].mxu0 }
 0x10d   :  { %4318 = vst [vmem:[#allocation2_spill] sm:$0xff] %v3842_v23  ;;  %4319 = vst [vmem:[#allocation3_spill] sm:$0xff] %v3846_v20  ;;  %v3848_v17 = vpop.f32.mrb[25].mxu1 }
 0x10e   :  { %4320 = vst [vmem:[#allocation4_spill] sm:$0xff] %v3848_v17  ;;  %v4358_v17 = vmax.f32 %v3702_v55, %v3704_v56  ;;  %v4360_v56 = vmax.f32 %v3714_v61, %v3716_v62  ;;  %v4362_v62 = vmax.f32 %v3726_v3, %v3728_v4  ;;  %v4364_v4 = vmax.f32 %v3738_v9, %v3740_v10 }
 0x10f   :  { %v3852_v14 = vpop.f32.mrb[26].mxu0  ;;  %v4366_v10 = vmax.f32 %v3750_v15, %v3752_v16  ;;  %v4368_v16 = vmax.f32 %v3762_v21, %v3764_v22  ;;  %v4370_v22 = vmax.f32 %v3774_v27, %v3776_v28  ;;  %v4372_v28 = vmax.f32 %v3786_v33, %v3788_v34 }
 0x110   :  { %4321 = vst [vmem:[#allocation5_spill] sm:$0xff] %v3852_v14  ;;  %v3854_v11 = vpop.f32.mrb[26].mxu1  ;;  %v3858_v8 = vpop.f32.mrb[27].mxu0  ;;  %v4357_v14 = vmax.f32 %v3696_v52, %v3698_v53  ;;  %v4359_v52 = vmax.f32 %v3708_v58, %v3710_v59  ;;  %v4361_v58 = vmax.f32 %v3720_v0, %v3722_v1  ;;  %v4363_v1 = vmax.f32 %v3732_v6, %v3734_v7 }
 0x111   :  { %4322 = vst [vmem:[#allocation6_spill] sm:$0xff] %v3854_v11  ;;  %4323 = vst [vmem:[#allocation7_spill] sm:$0xff] %v3858_v8  ;;  %v3860_v5 = vpop.f32.mrb[27].mxu1  ;;  %v4365_v7 = vmax.f32 %v3744_v12, %v3746_v13  ;;  %v4367_v13 = vmax.f32 %v3756_v18, %v3758_v19  ;;  %v4369_v19 = vmax.f32 %v3768_v24, %v3770_v25 }
 0x112   :  { %4324 = vst [vmem:[#allocation8_spill] sm:$0xff] %v3860_v5  ;;  %v4371_v25 = vmax.f32 %v3780_v30, %v3782_v31  ;;  %v4373_v31 = vmax.f32 %v3792_v36, %v3794_v37  ;;  %v4374_v34 = vmax.f32 %v3798_v39, %v3800_v40  ;;  %v4375_v37 = vmax.f32 %v3804_v42, %v3806_v43 }
 0x113   :  { %v3864_v2 = vpop.f32.mrb[28].mxu0  ;;  %v4376_v40 = vmax.f32 %v3810_v45, %v3812_v46  ;;  %v4377_v43 = vmax.f32 %v3816_v48, %v3818_v49  ;;  %v4378_v46 = vmax.f32 %v3822_v51, %v3824_v41  ;;  %v4379_v49 = vmax.f32 %v3828_v38, %v3830_v35 }
 0x114   :  { %4325 = vst [vmem:[#allocation9_spill] sm:$0xff] %v3864_v2  ;;  %v3866_v63 = vpop.f32.mrb[28].mxu1  ;;  %v3870_v60 = vpop.f32.mrb[29].mxu0  ;;  %v4380_v51 = vmax.f32 %v3834_v32, %v3836_v29  ;;  %v4381_v38 = vld [vmem:[#allocation2_spill] sm:$0xff]  ;;  %v4383_v32 = vld [vmem:[#allocation3_spill] sm:$0xff] }
 0x115   :  { %4326 = vst [vmem:[#allocation10_spill] sm:$0xff] %v3866_v63  ;;  %4327 = vst [vmem:[#allocation11_spill] sm:$0xff] %v3870_v60  ;;  %v3872_v57 = vpop.f32.mrb[29].mxu1 }
 0x116   :  { %4328 = vst [vmem:[#allocation12_spill] sm:$0xff] %v3872_v57 }
 0x117   :  { %v3876_v54 = vpop.f32.mrb[30].mxu0 }
 0x118   :  { %4329 = vst [vmem:[#allocation13_spill] sm:$0xff] %v3876_v54  ;;  %v3878_v11 = vpop.f32.mrb[30].mxu1  ;;  %v3882_v5 = vpop.f32.mrb[31].mxu0 }
 0x119   :  { %4330 = vst [vmem:[#allocation14_spill] sm:$0xff] %v3878_v11  ;;  %4331 = vst [vmem:[#allocation15_spill] sm:$0xff] %v3882_v5  ;;  %v3884_v8 = vpop.f32.mrb[31].mxu1 }
 0x11a   :  { %4332 = vst [vmem:[#allocation16_spill] sm:$0xff] %v3884_v8 }
 0x11b   :  { %v3888_v63 = vpop.f32.mrb[32].mxu0 }
 0x11c   :  { %4333 = vst [vmem:[#allocation17_spill] sm:$0xff] %v3888_v63  ;;  %v3890_v2 = vpop.f32.mrb[32].mxu1  ;;  %v3894_v57 = vpop.f32.mrb[33].mxu0 }
 0x11d   :  { %4334 = vst [vmem:[#allocation18_spill] sm:$0xff] %v3890_v2  ;;  %4335 = vst [vmem:[#allocation19_spill] sm:$0xff] %v3894_v57  ;;  %v3896_v60 = vpop.f32.mrb[33].mxu1 }
 0x11e   :  { %4336 = vst [vmem:[#allocation20_spill] sm:$0xff] %v3896_v60 }
 0x11f   :  { %v3900_v11 = vpop.f32.mrb[34].mxu0 }
 0x120   :  { %4337 = vst [vmem:[#allocation21_spill] sm:$0xff] %v3900_v11  ;;  %v3902_v54 = vpop.f32.mrb[34].mxu1  ;;  %v3906_v8 = vpop.f32.mrb[35].mxu0 }
 0x121   :  { %4338 = vst [vmem:[#allocation22_spill] sm:$0xff] %v3902_v54  ;;  %4339 = vst [vmem:[#allocation23_spill] sm:$0xff] %v3906_v8  ;;  %v3908_v5 = vpop.f32.mrb[35].mxu1 }
 0x122   :  { %4340 = vst [vmem:[#allocation24_spill] sm:$0xff] %v3908_v5 }
 0x123   :  { %v3912_v2 = vpop.f32.mrb[36].mxu0 }
 0x124   :  { %4341 = vst [vmem:[#allocation25_spill] sm:$0xff] %v3912_v2  ;;  %v3914_v63 = vpop.f32.mrb[36].mxu1  ;;  %v3918_v60 = vpop.f32.mrb[37].mxu0 }
 0x125   :  { %4342 = vst [vmem:[#allocation26_spill] sm:$0xff] %v3914_v63  ;;  %4343 = vst [vmem:[#allocation27_spill] sm:$0xff] %v3918_v60  ;;  %v3920_v57 = vpop.f32.mrb[37].mxu1 }
 0x126   :  { %4344 = vst [vmem:[#allocation28_spill] sm:$0xff] %v3920_v57 }
 0x127   :  { %v3924_v54 = vpop.f32.mrb[38].mxu0 }
 0x128   :  { %4345 = vst [vmem:[#allocation29_spill] sm:$0xff] %v3924_v54  ;;  %v3926_v11 = vpop.f32.mrb[38].mxu1  ;;  %v3930_v5 = vpop.f32.mrb[39].mxu0 }
 0x129   :  { %4346 = vst [vmem:[#allocation30_spill] sm:$0xff] %v3926_v11  ;;  %4347 = vst [vmem:[#allocation31_spill] sm:$0xff] %v3930_v5  ;;  %v3932_v8 = vpop.f32.mrb[39].mxu1 }
 0x12a   :  { %4348 = vst [vmem:[#allocation32_spill] sm:$0xff] %v3932_v8 }
 0x12b   :  { %v3936_v63 = vpop.f32.mrb[40].mxu0 }
 0x12c   :  { %4349 = vst [vmem:[#allocation33_spill] sm:$0xff] %v3936_v63  ;;  %v3938_v2 = vpop.f32.mrb[40].mxu1  ;;  %v3942_v57 = vpop.f32.mrb[41].mxu0 }
 0x12d   :  { %4350 = vst [vmem:[#allocation34_spill] sm:$0xff] %v3938_v2  ;;  %4351 = vst [vmem:[#allocation35_spill] sm:$0xff] %v3942_v57  ;;  %v3944_v60 = vpop.f32.mrb[41].mxu1 }
 0x12e   :  { %4352 = vst [vmem:[#allocation36_spill] sm:$0xff] %v3944_v60 }
 0x12f   :  { %v3948_v11 = vpop.f32.mrb[42].mxu0 }
 0x130   :  { %4353 = vst [vmem:[#allocation37_spill] sm:$0xff] %v3948_v11  ;;  %v3950_v54 = vpop.f32.mrb[42].mxu1  ;;  %v3954_v8 = vpop.f32.mrb[43].mxu0 }
 0x131   :  { %4354 = vst [vmem:[#allocation38_spill] sm:$0xff] %v3950_v54  ;;  %4355 = vst [vmem:[#allocation39_spill] sm:$0xff] %v3954_v8  ;;  %v3956_v5 = vpop.f32.mrb[43].mxu1 }
 0x132   :  { %4356 = vst [vmem:[#allocation40_spill] sm:$0xff] %v3956_v5 }
 0x133   :  { %v2786_v2 = vpop.f32.mrb[44].mxu0 }
 0x134   :  { %v2856_v63 = vpop.f32.mrb[44].mxu1  ;;  %v1451_v50 = vmax.f32 %v4357_v14, %v2786_v2  ;;  %v1231_v60 = vpop.f32.mrb[45].mxu0 }
 0x135   :  { %v1737_v57 = vpop.f32.mrb[45].mxu1  ;;  %v1450_v20 = vmax.f32 %v4358_v17, %v1231_v60 }
 0x136   :  { %v1957_v54 = vmax.f32 %v1451_v50, %v2856_v63 }
 0x137   :  { %v1956_v11 = vmax.f32 %v1450_v20, %v1737_v57  ;;  %v2789_v47 = vpop.f32.mrb[46].mxu0 }
 0x138   :  { %v2859_v5 = vpop.f32.mrb[46].mxu1  ;;  %v2008_v8 = vadd.f32 %v3969_v44, %v1957_v54  ;;  %v1453_v53 = vmax.f32 %v4359_v52, %v2789_v47  ;;  %v1241_v2 = vpop.f32.mrb[47].mxu0 }
 0x139   :  { %v1747_v14 = vpop.f32.mrb[47].mxu1  ;;  %v2007_v55 = vadd.f32 %v3969_v44, %v1956_v11  ;;  %v1452_v60 = vmax.f32 %v4360_v56, %v1241_v2 }
 0x13a   :  { %v2052_v17 = vmax.f32 %v2008_v8, 0.0  ;;  %v1959_v23 = vmax.f32 %v1453_v53, %v2859_v5 }
 0x13b   :  { %v2051_v63 = vmax.f32 %v2007_v55, 0.0  ;;  %v1958_v57 = vmax.f32 %v1452_v60, %v1747_v14  ;;  %v2792_v20 = vpop.f32.mrb[48].mxu0 }
 0x13c   :  { %v2862_v50 = vpop.f32.mrb[48].mxu1  ;;  %2096 = vst [vmem:[%s4276_s3 + $0x8] sm:$0xff] %v2052_v17  ;;  %v2010_v54 = vadd.f32 %v3969_v44, %v1959_v23  ;;  %v1455_v59 = vmax.f32 %v4361_v58, %v2792_v20  ;;  %v1251_v11 = vpop.f32.mrb[49].mxu0 }
 0x13d   :  { %v1757_v47 = vpop.f32.mrb[49].mxu1  ;;  %2095 = vst [vmem:[%s4276_s3] sm:$0xff] %v2051_v63  ;;  %v2009_v61 = vadd.f32 %v3969_v44, %v1958_v57  ;;  %v1454_v5 = vmax.f32 %v4362_v62, %v1251_v11 }
 0x13e   :  { %v2054_v8 = vmax.f32 %v2010_v54, 0.0  ;;  %v1961_v52 = vmax.f32 %v1455_v59, %v2862_v50 }
 0x13f   :  { %v2053_v53 = vmax.f32 %v2009_v61, 0.0  ;;  %v1960_v23 = vmax.f32 %v1454_v5, %v1757_v47  ;;  %v2795_v2 = vpop.f32.mrb[50].mxu0 }
 0x140   :  { %v2865_v14 = vpop.f32.mrb[50].mxu1  ;;  %2098 = vst [vmem:[%s4276_s3 + $0x18] sm:$0xff] %v2054_v8  ;;  %v2012_v0 = vadd.f32 %v3969_v44, %v1961_v52  ;;  %v1457_v55 = vmax.f32 %v4363_v1, %v2795_v2  ;;  %v1261_v56 = vpop.f32.mrb[51].mxu0 }
 0x141   :  { %v1767_v60 = vpop.f32.mrb[51].mxu1  ;;  %2097 = vst [vmem:[%s4276_s3 + $0x10] sm:$0xff] %v2053_v53  ;;  %v2011_v3 = vadd.f32 %v3969_v44, %v1960_v23  ;;  %v1456_v17 = vmax.f32 %v4364_v4, %v1261_v56 }
 0x142   :  { %v2056_v63 = vmax.f32 %v2012_v0, 0.0  ;;  %v1963_v57 = vmax.f32 %v1457_v55, %v2865_v14 }
 0x143   :  { %v2055_v20 = vmax.f32 %v2011_v3, 0.0  ;;  %v1962_v50 = vmax.f32 %v1456_v17, %v1767_v60  ;;  %v2798_v54 = vpop.f32.mrb[52].mxu0 }
 0x144   :  { %v2868_v58 = vpop.f32.mrb[52].mxu1  ;;  %2100 = vst [vmem:[%s4276_s3 + $0x28] sm:$0xff] %v2056_v63  ;;  %v2014_v6 = vadd.f32 %v3969_v44, %v1963_v57  ;;  %v1459_v59 = vmax.f32 %v4365_v7, %v2798_v54  ;;  %v1271_v11 = vpop.f32.mrb[53].mxu0 }
 0x145   :  { %v1777_v47 = vpop.f32.mrb[53].mxu1  ;;  %2099 = vst [vmem:[%s4276_s3 + $0x20] sm:$0xff] %v2055_v20  ;;  %v2013_v9 = vadd.f32 %v3969_v44, %v1962_v50  ;;  %v1458_v61 = vmax.f32 %v4366_v10, %v1271_v11 }
 0x146   :  { %v2058_v62 = vmax.f32 %v2014_v6, 0.0  ;;  %v1965_v5 = vmax.f32 %v1459_v59, %v2868_v58 }
 0x147   :  { %v2057_v8 = vmax.f32 %v2013_v9, 0.0  ;;  %v1964_v52 = vmax.f32 %v1458_v61, %v1777_v47  ;;  %v2801_v53 = vpop.f32.mrb[54].mxu0 }
 0x148   :  { %v2871_v23 = vpop.f32.mrb[54].mxu1  ;;  %2102 = vst [vmem:[%s4276_s3 + $0x38] sm:$0xff] %v2058_v62  ;;  %v2016_v12 = vadd.f32 %v3969_v44, %v1965_v5  ;;  %v1461_v2 = vmax.f32 %v4367_v13, %v2801_v53  ;;  %v1281_v14 = vpop.f32.mrb[55].mxu0 }
 0x149   :  { %v1787_v0 = vpop.f32.mrb[55].mxu1  ;;  %2101 = vst [vmem:[%s4276_s3 + $0x30] sm:$0xff] %v2057_v8  ;;  %v2015_v15 = vadd.f32 %v3969_v44, %v1964_v52  ;;  %v1460_v1 = vmax.f32 %v4368_v16, %v1281_v14 }
 0x14a   :  { %v2060_v55 = vmax.f32 %v2016_v12, 0.0  ;;  %v1967_v56 = vmax.f32 %v1461_v2, %v2871_v23 }
 0x14b   :  { %v2059_v60 = vmax.f32 %v2015_v15, 0.0  ;;  %v1966_v3 = vmax.f32 %v1460_v1, %v1787_v0  ;;  %v2804_v4 = vpop.f32.mrb[56].mxu0 }
 0x14c   :  { %v2874_v17 = vpop.f32.mrb[56].mxu1  ;;  %2104 = vst [vmem:[%s4276_s3 + $0x48] sm:$0xff] %v2060_v55  ;;  %v2018_v18 = vadd.f32 %v3969_v44, %v1967_v56  ;;  %v1463_v63 = vmax.f32 %v4369_v19, %v2804_v4  ;;  %v1291_v57 = vpop.f32.mrb[57].mxu0 }
 0x14d   :  { %v1797_v20 = vpop.f32.mrb[57].mxu1  ;;  %2103 = vst [vmem:[%s4276_s3 + $0x40] sm:$0xff] %v2059_v60  ;;  %v2017_v21 = vadd.f32 %v3969_v44, %v1966_v3  ;;  %v1462_v50 = vmax.f32 %v4370_v22, %v1291_v57 }
 0x14e   :  { %v2062_v54 = vmax.f32 %v2018_v18, 0.0  ;;  %v1969_v58 = vmax.f32 %v1463_v63, %v2874_v17 }
 0x14f   :  { %v2061_v6 = vmax.f32 %v2017_v21, 0.0  ;;  %v1968_v7 = vmax.f32 %v1462_v50, %v1797_v20  ;;  %v2807_v59 = vpop.f32.mrb[58].mxu0 }
 0x150   :  { %v2877_v11 = vpop.f32.mrb[58].mxu1  ;;  %2106 = vst [vmem:[%s4276_s3 + $0x58] sm:$0xff] %v2062_v54  ;;  %v2020_v24 = vadd.f32 %v3969_v44, %v1969_v58  ;;  %v1465_v47 = vmax.f32 %v4371_v25, %v2807_v59  ;;  %v1301_v9 = vpop.f32.mrb[59].mxu0 }
 0x151   :  { %v1807_v10 = vpop.f32.mrb[59].mxu1  ;;  %2105 = vst [vmem:[%s4276_s3 + $0x50] sm:$0xff] %v2061_v6  ;;  %v2019_v27 = vadd.f32 %v3969_v44, %v1968_v7  ;;  %v1464_v61 = vmax.f32 %v4372_v28, %v1301_v9 }
 0x152   :  { %v2064_v62 = vmax.f32 %v2020_v24, 0.0  ;;  %v1971_v5 = vmax.f32 %v1465_v47, %v2877_v11 }
 0x153   :  { %v2063_v8 = vmax.f32 %v2019_v27, 0.0  ;;  %v1970_v52 = vmax.f32 %v1464_v61, %v1807_v10  ;;  %v2810_v53 = vpop.f32.mrb[60].mxu0 }
 0x154   :  { %v2880_v23 = vpop.f32.mrb[60].mxu1  ;;  %2108 = vst [vmem:[%s4276_s3 + $0x68] sm:$0xff] %v2064_v62  ;;  %v2022_v30 = vadd.f32 %v3969_v44, %v1971_v5  ;;  %v1467_v12 = vmax.f32 %v4373_v31, %v2810_v53  ;;  %v1311_v13 = vpop.f32.mrb[61].mxu0  ;;  %v4382_v53 = vmax.f32 %v3840_v26, %v4381_v38 }
 0x155   :  { %v1817_v2 = vpop.f32.mrb[61].mxu1  ;;  %2107 = vst [vmem:[%s4276_s3 + $0x60] sm:$0xff] %v2063_v8  ;;  %v2021_v33 = vadd.f32 %v3969_v44, %v1970_v52  ;;  %v1466_v14 = vmax.f32 %v4374_v34, %v1311_v13 }
 0x156   :  { %v2066_v0 = vmax.f32 %v2022_v30, 0.0  ;;  %v1973_v15 = vmax.f32 %v1467_v12, %v2880_v23  ;;  %v4384_v12 = vld [vmem:[#allocation4_spill] sm:$0xff] }
 0x157   :  { %v2065_v16 = vmax.f32 %v2021_v33, 0.0  ;;  %v1972_v1 = vmax.f32 %v1466_v14, %v1817_v2  ;;  %v2813_v55 = vpop.f32.mrb[62].mxu0  ;;  %v4385_v13 = vmax.f32 %v4383_v32, %v4384_v12 }
 0x158   :  { %v2883_v56 = vpop.f32.mrb[62].mxu1  ;;  %2110 = vst [vmem:[%s4276_s3 + $0x78] sm:$0xff] %v2066_v0  ;;  %v2024_v36 = vadd.f32 %v3969_v44, %v1973_v15  ;;  %v1469_v60 = vmax.f32 %v4375_v37, %v2813_v55  ;;  %v1321_v3 = vpop.f32.mrb[63].mxu0  ;;  %v4387_v55 = vld [vmem:[#allocation6_spill] sm:$0xff] }
 0x159   :  { %v1827_v4 = vpop.f32.mrb[63].mxu1  ;;  %2109 = vst [vmem:[%s4276_s3 + $0x70] sm:$0xff] %v2065_v16  ;;  %v2023_v39 = vadd.f32 %v3969_v44, %v1972_v1  ;;  %v1468_v17 = vmax.f32 %v4376_v40, %v1321_v3  ;;  %v4386_v1 = vld [vmem:[#allocation5_spill] sm:$0xff] }
 0x15a   :  { %v2068_v18 = vmax.f32 %v2024_v36, 0.0  ;;  %v1975_v19 = vmax.f32 %v1469_v60, %v2883_v56  ;;  %v4388_v56 = vmax.f32 %v4386_v1, %v4387_v55 }
 0x15b   :  { %v2067_v63 = vmax.f32 %v2023_v39, 0.0  ;;  %v1974_v57 = vmax.f32 %v1468_v17, %v1827_v4  ;;  %v2816_v20 = vpop.f32.mrb[64].mxu0  ;;  %v4389_v4 = vld [vmem:[#allocation7_spill] sm:$0xff]  ;;  %v4390_v39 = vld [vmem:[#allocation8_spill] sm:$0xff] }
 0x15c   :  { %v2886_v21 = vpop.f32.mrb[64].mxu1  ;;  %2112 = vst [vmem:[%s4276_s3 + $0x88] sm:$0xff] %v2068_v18  ;;  %v2026_v42 = vadd.f32 %v3969_v44, %v1975_v19  ;;  %v1471_v22 = vmax.f32 %v4377_v43, %v2816_v20  ;;  %v1331_v50 = vpop.f32.mrb[65].mxu0  ;;  %v4391_v40 = vmax.f32 %v4389_v4, %v4390_v39  ;;  %v4392_v43 = vld [vmem:[#allocation9_spill] sm:$0xff] }
 0x15d   :  { %v1837_v54 = vpop.f32.mrb[65].mxu1  ;;  %2111 = vst [vmem:[%s4276_s3 + $0x80] sm:$0xff] %v2067_v63  ;;  %v2025_v45 = vadd.f32 %v3969_v44, %v1974_v57  ;;  %v1470_v58 = vmax.f32 %v4378_v46, %v1331_v50 }
 0x15e   :  { %v2070_v6 = vmax.f32 %v2026_v42, 0.0  ;;  %v1977_v7 = vmax.f32 %v1471_v22, %v2886_v21  ;;  %v4393_v22 = vld [vmem:[#allocation10_spill] sm:$0xff] }
 0x15f   :  { %v2069_v59 = vmax.f32 %v2025_v45, 0.0  ;;  %v1976_v11 = vmax.f32 %v1470_v58, %v1837_v54  ;;  %v2819_v24 = vpop.f32.mrb[66].mxu0  ;;  %v4394_v50 = vmax.f32 %v4392_v43, %v4393_v22 }
 0x160   :  { %v2889_v25 = vpop.f32.mrb[66].mxu1  ;;  %2114 = vst [vmem:[%s4276_s3 + $0x98] sm:$0xff] %v2070_v6  ;;  %v2028_v48 = vadd.f32 %v3969_v44, %v1977_v7  ;;  %v1473_v47 = vmax.f32 %v4379_v49, %v2819_v24  ;;  %v1341_v9 = vpop.f32.mrb[67].mxu0  ;;  %v4395_v6 = vld [vmem:[#allocation11_spill] sm:$0xff]  ;;  %v4396_v7 = vld [vmem:[#allocation12_spill] sm:$0xff] }
 0x161   :  { %v1847_v10 = vpop.f32.mrb[67].mxu1  ;;  %2113 = vst [vmem:[%s4276_s3 + $0x90] sm:$0xff] %v2069_v59  ;;  %v2027_v41 = vadd.f32 %v3969_v44, %v1976_v11  ;;  %v1472_v27 = vmax.f32 %v4380_v51, %v1341_v9  ;;  %v4397_v59 = vmax.f32 %v4395_v6, %v4396_v7  ;;  %v4399_v51 = vld [vmem:[#allocation14_spill] sm:$0xff] }
 0x162   :  { %v2072_v28 = vmax.f32 %v2028_v48, 0.0  ;;  %v1979_v61 = vmax.f32 %v1473_v47, %v2889_v25 }
 0x163   :  { %v2071_v62 = vmax.f32 %v2027_v41, 0.0  ;;  %v1978_v5 = vmax.f32 %v1472_v27, %v1847_v10  ;;  %v2822_v8 = vpop.f32.mrb[68].mxu0  ;;  %v4398_v41 = vld [vmem:[#allocation13_spill] sm:$0xff] }
 0x164   :  { %v2892_v52 = vpop.f32.mrb[68].mxu1  ;;  %2116 = vst [vmem:[%s4276_s3 + $0xa8] sm:$0xff] %v2072_v28  ;;  %v2030_v35 = vadd.f32 %v3969_v44, %v1979_v61  ;;  %v1475_v23 = vmax.f32 %v4382_v53, %v2822_v8  ;;  %v1351_v30 = vpop.f32.mrb[69].mxu0  ;;  %v4400_v27 = vmax.f32 %v4398_v41, %v4399_v51  ;;  %v4401_v8 = vld [vmem:[#allocation15_spill] sm:$0xff] }
 0x165   :  { %v1857_v31 = vpop.f32.mrb[69].mxu1  ;;  %2115 = vst [vmem:[%s4276_s3 + $0xa0] sm:$0xff] %v2071_v62  ;;  %v2029_v29 = vadd.f32 %v3969_v44, %v1978_v5  ;;  %v1474_v2 = vmax.f32 %v4385_v13, %v1351_v30  ;;  %v4404_v13 = vld [vmem:[#allocation17_spill] sm:$0xff] }
 0x166   :  { %v2074_v33 = vmax.f32 %v2030_v35, 0.0  ;;  %v1981_v34 = vmax.f32 %v1475_v23, %v2892_v52  ;;  %v4402_v52 = vld [vmem:[#allocation16_spill] sm:$0xff] }
 0x167   :  { %v2073_v14 = vmax.f32 %v2029_v29, 0.0  ;;  %v1980_v0 = vmax.f32 %v1474_v2, %v1857_v31  ;;  %v2825_v15 = vpop.f32.mrb[70].mxu0  ;;  %v4403_v35 = vmax.f32 %v4401_v8, %v4402_v52  ;;  %v4405_v2 = vld [vmem:[#allocation18_spill] sm:$0xff] }
 0x168   :  { %v2895_v16 = vpop.f32.mrb[70].mxu1  ;;  %2118 = vst [vmem:[%s4276_s3 + $0xb8] sm:$0xff] %v2074_v33  ;;  %v2032_v26 = vadd.f32 %v3969_v44, %v1981_v34  ;;  %v1477_v36 = vmax.f32 %v4388_v56, %v2825_v15  ;;  %v1361_v37 = vpop.f32.mrb[71].mxu0  ;;  %v4406_v33 = vmax.f32 %v4404_v13, %v4405_v2 }
 0x169   :  { %v1867_v60 = vpop.f32.mrb[71].mxu1  ;;  %2117 = vst [vmem:[%s4276_s3 + $0xb0] sm:$0xff] %v2073_v14  ;;  %v2031_v3 = vadd.f32 %v3969_v44, %v1980_v0  ;;  %v1476_v17 = vmax.f32 %v4391_v40, %v1361_v37  ;;  %v4410_v40 = vld [vmem:[#allocation21_spill] sm:$0xff] }
 0x16a   :  { %v2076_v18 = vmax.f32 %v2032_v26, 0.0  ;;  %v1983_v19 = vmax.f32 %v1477_v36, %v2895_v16  ;;  %v4407_v16 = vld [vmem:[#allocation19_spill] sm:$0xff]  ;;  %v4408_v26 = vld [vmem:[#allocation20_spill] sm:$0xff] }
 0x16b   :  { %v2075_v63 = vmax.f32 %v2031_v3, 0.0  ;;  %v1982_v57 = vmax.f32 %v1476_v17, %v1867_v60  ;;  %v2828_v20 = vpop.f32.mrb[72].mxu0  ;;  %v4409_v1 = vmax.f32 %v4407_v16, %v4408_v26  ;;  %v4411_v17 = vld [vmem:[#allocation22_spill] sm:$0xff] }
 0x16c   :  { %v2898_v21 = vpop.f32.mrb[72].mxu1  ;;  %2120 = vst [vmem:[%s4276_s3 + $0xc8] sm:$0xff] %v2076_v18  ;;  %v2034_v42 = vadd.f32 %v3969_v44, %v1983_v19  ;;  %v1479_v54 = vmax.f32 %v4394_v50, %v2828_v20  ;;  %v1371_v45 = vpop.f32.mrb[73].mxu0  ;;  %v4412_v18 = vmax.f32 %v4410_v40, %v4411_v17 }
 0x16d   :  { %v1877_v46 = vpop.f32.mrb[73].mxu1  ;;  %2119 = vst [vmem:[%s4276_s3 + $0xc0] sm:$0xff] %v2075_v63  ;;  %v2033_v58 = vadd.f32 %v3969_v44, %v1982_v57  ;;  %v1478_v11 = vmax.f32 %v4397_v59, %v1371_v45  ;;  %v4416_v59 = vld [vmem:[#allocation25_spill] sm:$0xff] }
 0x16e   :  { %v2078_v24 = vmax.f32 %v2034_v42, 0.0  ;;  %v1985_v25 = vmax.f32 %v1479_v54, %v2898_v21  ;;  %v4413_v21 = vld [vmem:[#allocation23_spill] sm:$0xff]  ;;  %v4414_v42 = vld [vmem:[#allocation24_spill] sm:$0xff] }
 0x16f   :  { %v2077_v48 = vmax.f32 %v2033_v58, 0.0  ;;  %v1984_v49 = vmax.f32 %v1478_v11, %v1877_v46  ;;  %v2831_v47 = vpop.f32.mrb[74].mxu0  ;;  %v4415_v43 = vmax.f32 %v4413_v21, %v4414_v42  ;;  %v4417_v11 = vld [vmem:[#allocation26_spill] sm:$0xff] }
 0x170   :  { %v2901_v9 = vpop.f32.mrb[74].mxu1  ;;  %2122 = vst [vmem:[%s4276_s3 + $0xd8] sm:$0xff] %v2078_v24  ;;  %v2036_v10 = vadd.f32 %v3969_v44, %v1985_v25  ;;  %v1481_v28 = vmax.f32 %v4400_v27, %v2831_v47  ;;  %v1381_v61 = vpop.f32.mrb[75].mxu0  ;;  %v4418_v24 = vmax.f32 %v4416_v59, %v4417_v11 }
 0x171   :  { %v1887_v62 = vpop.f32.mrb[75].mxu1  ;;  %2121 = vst [vmem:[%s4276_s3 + $0xd0] sm:$0xff] %v2077_v48  ;;  %v2035_v5 = vadd.f32 %v3969_v44, %v1984_v49  ;;  %v1480_v38 = vmax.f32 %v4403_v35, %v1381_v61  ;;  %v4422_v35 = vld [vmem:[#allocation29_spill] sm:$0xff] }
 0x172   :  { %v2080_v53 = vmax.f32 %v2036_v10, 0.0  ;;  %v1987_v23 = vmax.f32 %v1481_v28, %v2901_v9  ;;  %v4419_v9 = vld [vmem:[#allocation27_spill] sm:$0xff]  ;;  %v4420_v10 = vld [vmem:[#allocation28_spill] sm:$0xff] }
 0x173   :  { %v2079_v30 = vmax.f32 %v2035_v5, 0.0  ;;  %v1986_v31 = vmax.f32 %v1480_v38, %v1887_v62  ;;  %v2834_v29 = vpop.f32.mrb[76].mxu0  ;;  %v4421_v41 = vmax.f32 %v4419_v9, %v4420_v10  ;;  %v4423_v38 = vld [vmem:[#allocation30_spill] sm:$0xff] }
 0x174   :  { %v2904_v32 = vpop.f32.mrb[76].mxu1  ;;  %2124 = vst [vmem:[%s4276_s3 + $0xe8] sm:$0xff] %v2080_v53  ;;  %v2038_v12 = vadd.f32 %v3969_v44, %v1987_v23  ;;  %v1483_v34 = vmax.f32 %v4406_v33, %v2834_v29  ;;  %v1391_v14 = vpop.f32.mrb[77].mxu0  ;;  %v4424_v53 = vmax.f32 %v4422_v35, %v4423_v38 }
 0x175   :  { %v1897_v0 = vpop.f32.mrb[77].mxu1  ;;  %2123 = vst [vmem:[%s4276_s3 + $0xe0] sm:$0xff] %v2079_v30  ;;  %v2037_v15 = vadd.f32 %v3969_v44, %v1986_v31  ;;  %v1482_v55 = vmax.f32 %v4409_v1, %v1391_v14  ;;  %v4428_v1 = vld [vmem:[#allocation33_spill] sm:$0xff] }
 0x176   :  { %v2082_v56 = vmax.f32 %v2038_v12, 0.0  ;;  %v1989_v36 = vmax.f32 %v1483_v34, %v2904_v32  ;;  %v4425_v32 = vld [vmem:[#allocation31_spill] sm:$0xff]  ;;  %v4426_v12 = vld [vmem:[#allocation32_spill] sm:$0xff] }
 0x177   :  { %v2081_v37 = vmax.f32 %v2037_v15, 0.0  ;;  %v1988_v60 = vmax.f32 %v1482_v55, %v1897_v0  ;;  %v2837_v3 = vpop.f32.mrb[78].mxu0  ;;  %v4427_v13 = vmax.f32 %v4425_v32, %v4426_v12  ;;  %v4429_v55 = vld [vmem:[#allocation34_spill] sm:$0xff] }
 0x178   :  { %v2907_v4 = vpop.f32.mrb[78].mxu1  ;;  %2126 = vst [vmem:[%s4276_s3 + $0xf8] sm:$0xff] %v2082_v56  ;;  %v2040_v39 = vadd.f32 %v3969_v44, %v1989_v36  ;;  %v1485_v19 = vmax.f32 %v4412_v18, %v2837_v3  ;;  %v1401_v63 = vpop.f32.mrb[79].mxu0  ;;  %v4430_v56 = vmax.f32 %v4428_v1, %v4429_v55 }
 0x179   :  { %v1907_v57 = vpop.f32.mrb[79].mxu1  ;;  %2125 = vst [vmem:[%s4276_s3 + $0xf0] sm:$0xff] %v2081_v37  ;;  %v2039_v20 = vadd.f32 %v3969_v44, %v1988_v60  ;;  %v1484_v22 = vmax.f32 %v4415_v43, %v1401_v63  ;;  %v4434_v43 = vld [vmem:[#allocation37_spill] sm:$0xff] }
 0x17a   :  { %v2084_v50 = vmax.f32 %v2040_v39, 0.0  ;;  %v1991_v54 = vmax.f32 %v1485_v19, %v2907_v4  ;;  %v4431_v4 = vld [vmem:[#allocation35_spill] sm:$0xff]  ;;  %v4432_v39 = vld [vmem:[#allocation36_spill] sm:$0xff] }
 0x17b   :  { %v2083_v45 = vmax.f32 %v2039_v20, 0.0  ;;  %v1990_v46 = vmax.f32 %v1484_v22, %v1907_v57  ;;  %v2840_v58 = vpop.f32.mrb[80].mxu0  ;;  %v4433_v40 = vmax.f32 %v4431_v4, %v4432_v39  ;;  %v4435_v22 = vld [vmem:[#allocation38_spill] sm:$0xff] }
 0x17c   :  { %v2910_v6 = vpop.f32.mrb[80].mxu1  ;;  %2128 = vst [vmem:[%s4276_s3 + $0x108] sm:$0xff] %v2084_v50  ;;  %v2042_v7 = vadd.f32 %v3969_v44, %v1991_v54  ;;  %v1487_v25 = vmax.f32 %v4418_v24, %v2840_v58  ;;  %v1411_v48 = vpop.f32.mrb[81].mxu0  ;;  %v4436_v50 = vmax.f32 %v4434_v43, %v4435_v22 }
 0x17d   :  { %v1917_v49 = vpop.f32.mrb[81].mxu1  ;;  %2127 = vst [vmem:[%s4276_s3 + $0x100] sm:$0xff] %v2083_v45  ;;  %v2041_v47 = vadd.f32 %v3969_v44, %v1990_v46  ;;  %v1486_v51 = vmax.f32 %v4421_v41, %v1411_v48 }
 0x17e   :  { %v2086_v27 = vmax.f32 %v2042_v7, 0.0  ;;  %v1993_v28 = vmax.f32 %v1487_v25, %v2910_v6  ;;  %v4437_v6 = vld [vmem:[#allocation39_spill] sm:$0xff]  ;;  %v4438_v7 = vld [vmem:[#allocation40_spill] sm:$0xff] }
 0x17f   :  { %v2085_v61 = vmax.f32 %v2041_v47, 0.0  ;;  %v1992_v62 = vmax.f32 %v1486_v51, %v1917_v49  ;;  %v2843_v5 = vpop.f32.mrb[82].mxu0  ;;  %v4439_v59 = vmax.f32 %v4437_v6, %v4438_v7 }
 0x180   :  { %v2913_v8 = vpop.f32.mrb[82].mxu1  ;;  %2130 = vst [vmem:[%s4276_s3 + $0x118] sm:$0xff] %v2086_v27  ;;  %v2044_v52 = vadd.f32 %v3969_v44, %v1993_v28  ;;  %v1489_v23 = vmax.f32 %v4424_v53, %v2843_v5  ;;  %v1421_v30 = vpop.f32.mrb[83].mxu0 }
 0x181   :  { %v1927_v31 = vpop.f32.mrb[83].mxu1  ;;  %2129 = vst [vmem:[%s4276_s3 + $0x110] sm:$0xff] %v2085_v61  ;;  %v2043_v29 = vadd.f32 %v3969_v44, %v1992_v62  ;;  %v1488_v2 = vmax.f32 %v4427_v13, %v1421_v30 }
 0x182   :  { %v2088_v33 = vmax.f32 %v2044_v52, 0.0  ;;  %v1995_v34 = vmax.f32 %v1489_v23, %v2913_v8 }
 0x183   :  { %v2087_v14 = vmax.f32 %v2043_v29, 0.0  ;;  %v1994_v0 = vmax.f32 %v1488_v2, %v1927_v31  ;;  %v2846_v15 = vpop.f32.mrb[84].mxu0 }
 0x184   :  { %v2916_v16 = vpop.f32.mrb[84].mxu1  ;;  %2132 = vst [vmem:[%s4276_s3 + $0x128] sm:$0xff] %v2088_v33  ;;  %v2046_v26 = vadd.f32 %v3969_v44, %v1995_v34  ;;  %v1491_v36 = vmax.f32 %v4430_v56, %v2846_v15  ;;  %v1431_v37 = vpop.f32.mrb[85].mxu0 }
 0x185   :  { %v1937_v60 = vpop.f32.mrb[85].mxu1  ;;  %2131 = vst [vmem:[%s4276_s3 + $0x120] sm:$0xff] %v2087_v14  ;;  %v2045_v3 = vadd.f32 %v3969_v44, %v1994_v0  ;;  %v1490_v17 = vmax.f32 %v4433_v40, %v1431_v37 }
 0x186   :  { %v2090_v18 = vmax.f32 %v2046_v26, 0.0  ;;  %v1997_v19 = vmax.f32 %v1491_v36, %v2916_v16 }
 0x187   :  { %v2089_v63 = vmax.f32 %v2045_v3, 0.0  ;;  %v1996_v57 = vmax.f32 %v1490_v17, %v1937_v60  ;;  %v2849_v20 = vpop.f32.mrb[86].mxu0 }
 0x188   :  { %v2919_v21 = vpop.f32.mrb[86].mxu1  ;;  %2134 = vst [vmem:[%s4276_s3 + $0x138] sm:$0xff] %v2090_v18  ;;  %v2048_v42 = vadd.f32 %v3969_v44, %v1997_v19  ;;  %v1493_v54 = vmax.f32 %v4436_v50, %v2849_v20  ;;  %v1441_v45 = vpop.f32.mrb[87].mxu0 }
 0x189   :  { %v1947_v46 = vpop.f32.mrb[87].mxu1  ;;  %2133 = vst [vmem:[%s4276_s3 + $0x130] sm:$0xff] %v2089_v63  ;;  %v2047_v58 = vadd.f32 %v3969_v44, %v1996_v57  ;;  %v1492_v11 = vmax.f32 %v4439_v59, %v1441_v45 }
 0x18a   :  { %v2092_v24 = vmax.f32 %v2048_v42, 0.0  ;;  %v1999_v25 = vmax.f32 %v1493_v54, %v2919_v21 }
 0x18b   :  { %v2091_v48 = vmax.f32 %v2047_v58, 0.0  ;;  %v1998_v49 = vmax.f32 %v1492_v11, %v1947_v46 }
 0x18c   :  { %2136 = vst [vmem:[%s4276_s3 + $0x148] sm:$0xff] %v2092_v24  ;;  %v2050_v47 = vadd.f32 %v3969_v44, %v1999_v25 }
 0x18d   :  { %2135 = vst [vmem:[%s4276_s3 + $0x140] sm:$0xff] %v2091_v48  ;;  %v2049_v9 = vadd.f32 %v3969_v44, %v1998_v49 }
 0x18e   :  { %v2094_v10 = vmax.f32 %v2050_v47, 0.0 }
 0x18f   :  { %v2093_v41 = vmax.f32 %v2049_v9, 0.0 }
 0x190   :  { %2138 = vst [vmem:[%s4276_s3 + $0x158] sm:$0xff] %v2094_v10 }
 0x191   :  { %2137 = vst [vmem:[%s4276_s3 + $0x150] sm:$0xff] %v2093_v41 }

// kernel: forward.4
= control target key start
LH: loop header
LB: loop body
LE: loop exit
PB: predicated region body
PF: predicated region fallthrough
CT: control target
= control target key end

     0   :  { %vm29_vm0 = vcmask 441344   ;;  %vm54_vm1 = vcmask 1045504   ;;  %s1113_s1 = inlined_call_operand.vmem [shape: f32[54,128], index: 1, kind: input, shape index: {}]   ;;  %s1114_s0 = inlined_call_operand.vmem [shape: f32[4,64,54], index: 0, kind: input, shape index: {}]   ;;  %s1115_s2 = inlined_call_operand.vmem [shape: f32[1,128], index: 2, kind: input, shape index: {}]   ;;  %s1116_s3 = inlined_call_operand.vmem [shape: f32[64,128], index: 3, kind: output, shape index: {}]  }
   0x1   :  { %v14_v0 = vld [vmem:[%s1113_s1] sm:$0xff]  ;;  %v15_v1 = vld [vmem:[%s1113_s1 + $0x8] sm:$0xff]  ;;  %v16_v2 = vld [vmem:[%s1113_s1 + $0x10] sm:$0xff] }
   0x2   :  { %v861_v3 = vpack.c.bf16 %v15_v1, %v14_v0  ;;  %v17_v4 = vld [vmem:[%s1113_s1 + $0x18] sm:$0xff]  ;;  %v18_v6 = vld [vmem:[%s1113_s1 + $0x20] sm:$0xff]  ;;  %v19_v7 = vld [vmem:[%s1113_s1 + $0x28] sm:$0xff] }
   0x3   :  { %v865_v5 = vpack.c.bf16 %v17_v4, %v16_v2  ;;  %v21_v8 = vld [vmem:[%s1114_s0] sm:$0xff]  ;;  %v869_v10 = vpack.c.bf16 %v19_v7, %v18_v6  ;;  %v20_v11 = vld [vmem:[%s1113_s1 + $0x30] sm:$0x3f]  ;;  %v22_v12 = vld [vmem:[%s1114_s0 + $0x8] sm:$0xff] }
   0x4   :  { %862 = vmatprep.subr.bf16.mxu0 %v861_v3  ;;  %874 = vmatprep.subr.bf16.mxu1 %v861_v3  ;;  %v645_v9 = vld [vmem:[%s1114_s0 + $0x40] sm:$0xff]  ;;  %v646_v13 = vld [vmem:[%s1114_s0 + $0x48] sm:$0xff]  ;;  %v23_v14 = vld [vmem:[%s1114_s0 + $0x10] sm:$0xff] }
   0x5   :  { %864 = vmatpush3.bf16.msra.mxu0 %v861_v3  ;;  %876 = vmatpush3.bf16.msra.mxu1 %v861_v3  ;;  %v647_v15 = vld [vmem:[%s1114_s0 + $0x50] sm:$0xff]  ;;  %v24_v16 = vld [vmem:[%s1114_s0 + $0x18] sm:$0xff]  ;;  %v25_v18 = vld [vmem:[%s1114_s0 + $0x20] sm:$0xff] }
   0x6   :  { %866 = vmatprep.subr.bf16.mxu0 %v865_v5  ;;  %878 = vmatprep.subr.bf16.mxu1 %v865_v5  ;;  %v648_v17 = vld [vmem:[%s1114_s0 + $0x58] sm:$0xff]  ;;  %v649_v19 = vld [vmem:[%s1114_s0 + $0x60] sm:$0xff]  ;;  %v26_v20 = vld [vmem:[%s1114_s0 + $0x28] sm:$0xff] }
   0x7   :  { %771 = vmatprep.mubr.msk.f32.mxu0 %vm29_vm0, %v21_v8  ;;  %797 = vmatprep.mubr.msk.f32.mxu1 %vm29_vm0, %v645_v9  ;;  %v650_v21 = vld [vmem:[%s1114_s0 + $0x68] sm:$0xff]  ;;  %v27_v22 = vld [vmem:[%s1114_s0 + $0x30] sm:$0xff]  ;;  %v28_v24 = vld [vmem:[%s1114_s0 + $0x38] sm:$0xff] }
   0x8   :  { %v651_v23 = vld [vmem:[%s1114_s0 + $0x70] sm:$0xff]  ;;  %v652_v25 = vld [vmem:[%s1114_s0 + $0x78] sm:$0xff]  ;;  %v662_v26 = vld [vmem:[%s1114_s0 + $0x80] sm:$0xff] }
   0x9   :  { %868 = vmatpush3.bf16.msra.mxu0 %v865_v5  ;;  %880 = vmatpush3.bf16.msra.mxu1 %v865_v5  ;;  %v679_v27 = vld [vmem:[%s1114_s0 + $0xc0] sm:$0xff]  ;;  %v663_v28 = vld [vmem:[%s1114_s0 + $0x88] sm:$0xff]  ;;  %v664_v30 = vld [vmem:[%s1114_s0 + $0x90] sm:$0xff] }
   0xa   :  { %870 = vmatprep.subr.bf16.mxu0 %v869_v10  ;;  %882 = vmatprep.subr.bf16.mxu1 %v869_v10  ;;  %v680_v29 = vld [vmem:[%s1114_s0 + $0xc8] sm:$0xff]  ;;  %v681_v31 = vld [vmem:[%s1114_s0 + $0xd0] sm:$0xff]  ;;  %v665_v32 = vld [vmem:[%s1114_s0 + $0x98] sm:$0xff] }
   0xb   :  { %v682_v33 = vld [vmem:[%s1114_s0 + $0xd8] sm:$0xff]  ;;  %v666_v34 = vld [vmem:[%s1114_s0 + $0xa0] sm:$0xff]  ;;  %v667_v36 = vld [vmem:[%s1114_s0 + $0xa8] sm:$0xff] }
   0xc   :  { %v683_v35 = vld [vmem:[%s1114_s0 + $0xe0] sm:$0xff]  ;;  %v684_v37 = vld [vmem:[%s1114_s0 + $0xe8] sm:$0xff]  ;;  %v668_v38 = vld [vmem:[%s1114_s0 + $0xb0] sm:$0xff] }
   0xd   :  { %872 = vmatpush3.bf16.msra.mxu0 %v869_v10  ;;  %884 = vmatpush3.bf16.msra.mxu1 %v869_v10  ;;  %v685_v39 = vld [vmem:[%s1114_s0 + $0xf0] sm:$0xff]  ;;  %v669_v40 = vld [vmem:[%s1114_s0 + $0xb8] sm:$0xff]  ;;  %v696_v8 = vld [vmem:[%s1115_s2] ss:$0 sm:$0xff] }
   0xe   :  { %769 = vmatprep.subr.msk.mxu0 %vm54_vm1, %v20_v11  ;;  %795 = vmatprep.subr.msk.mxu1 %vm54_vm1, %v20_v11  ;;  %v686_v41 = vld [vmem:[%s1114_s0 + $0xf8] sm:$0xff] }
  0x11   :  { %770 = vmatpush3.msk.msra.mxu0 %vm54_vm1, %v20_v11  ;;  %796 = vmatpush3.msk.msra.mxu1 %vm54_vm1, %v20_v11 }
  0x12   :  { %772 = vmatmul.mubr.msk.f32.vlgmr.msra.gmra.mrb[0].mxu0 %vm29_vm0, %v22_v12  ;;  %798 = vmatmul.mubr.msk.f32.vlgmr.msra.gmra.mrb[0].mxu1 %vm29_vm0, %v646_v13 }
  0x13   :  { %886 = vmatprep.subr.bf16.mxu0 %v861_v3  ;;  %898 = vmatprep.subr.bf16.mxu1 %v861_v3 }
  0x14   :  { %888 = vmatpush3.bf16.msra.mxu0 %v861_v3  ;;  %774 = vmatprep.mubr.msk.f32.mxu0 %vm29_vm0, %v23_v14 }
  0x15   :  { %800 = vmatprep.mubr.msk.f32.mxu1 %vm29_vm0, %v647_v15  ;;  %900 = vmatpush3.bf16.msra.mxu1 %v861_v3 }
  0x16   :  { %775 = vmatmul.mubr.msk.f32.gmra.mrb[2].mxu0 %vm29_vm0, %v24_v16  ;;  %801 = vmatmul.mubr.msk.f32.gmra.mrb[2].mxu1 %vm29_vm0, %v648_v17 }
  0x17   :  { %890 = vmatprep.subr.bf16.mxu0 %v865_v5  ;;  %902 = vmatprep.subr.bf16.mxu1 %v865_v5 }
  0x18   :  { %892 = vmatpush3.bf16.msra.mxu0 %v865_v5  ;;  %777 = vmatprep.mubr.msk.f32.mxu0 %vm29_vm0, %v25_v18 }
  0x19   :  { %803 = vmatprep.mubr.msk.f32.mxu1 %vm29_vm0, %v649_v19  ;;  %904 = vmatpush3.bf16.msra.mxu1 %v865_v5 }
  0x1a   :  { %778 = vmatmul.mubr.msk.f32.gmra.mrb[4].mxu0 %vm29_vm0, %v26_v20  ;;  %804 = vmatmul.mubr.msk.f32.gmra.mrb[4].mxu1 %vm29_vm0, %v650_v21 }
  0x1b   :  { %894 = vmatprep.subr.bf16.mxu0 %v869_v10  ;;  %906 = vmatprep.subr.bf16.mxu1 %v869_v10 }
  0x1c   :  { %896 = vmatpush3.bf16.msra.mxu0 %v869_v10  ;;  %780 = vmatprep.mubr.msk.f32.mxu0 %vm29_vm0, %v27_v22 }
  0x1d   :  { %806 = vmatprep.mubr.msk.f32.mxu1 %vm29_vm0, %v651_v23  ;;  %908 = vmatpush3.bf16.msra.mxu1 %v869_v10 }
  0x1e   :  { %781 = vmatmul.mubr.msk.f32.gmra.mrb[6].mxu0 %vm29_vm0, %v28_v24  ;;  %807 = vmatmul.mubr.msk.f32.gmra.mrb[6].mxu1 %vm29_vm0, %v652_v25 }
  0x1f   :  { %821 = vmatprep.subr.msk.mxu0 %vm54_vm1, %v20_v11  ;;  %847 = vmatprep.subr.msk.mxu1 %vm54_vm1, %v20_v11 }
  0x20   :  { %822 = vmatpush3.msk.msra.mxu0 %vm54_vm1, %v20_v11  ;;  %823 = vmatprep.mubr.msk.f32.mxu0 %vm29_vm0, %v662_v26 }
  0x21   :  { %848 = vmatpush3.msk.msra.mxu1 %vm54_vm1, %v20_v11  ;;  %849 = vmatprep.mubr.msk.f32.mxu1 %vm29_vm0, %v679_v27 }
  0x22   :  { %824 = vmatmul.mubr.msk.f32.vlgmr.msra.gmra.mrb[8].mxu0 %vm29_vm0, %v663_v28  ;;  %850 = vmatmul.mubr.msk.f32.vlgmr.msra.gmra.mrb[8].mxu1 %vm29_vm0, %v680_v29 }
  0x23   :  { %826 = vmatprep.mubr.msk.f32.mxu0 %vm29_vm0, %v664_v30  ;;  %852 = vmatprep.mubr.msk.f32.mxu1 %vm29_vm0, %v681_v31 }
  0x26   :  { %827 = vmatmul.mubr.msk.f32.gmra.mrb[10].mxu0 %vm29_vm0, %v665_v32  ;;  %853 = vmatmul.mubr.msk.f32.gmra.mrb[10].mxu1 %vm29_vm0, %v682_v33 }
  0x27   :  { %829 = vmatprep.mubr.msk.f32.mxu0 %vm29_vm0, %v666_v34  ;;  %855 = vmatprep.mubr.msk.f32.mxu1 %vm29_vm0, %v683_v35 }
  0x2a   :  { %830 = vmatmul.mubr.msk.f32.gmra.mrb[12].mxu0 %vm29_vm0, %v667_v36  ;;  %856 = vmatmul.mubr.msk.f32.gmra.mrb[12].mxu1 %vm29_vm0, %v684_v37 }
  0x2b   :  { %832 = vmatprep.mubr.msk.f32.mxu0 %vm29_vm0, %v668_v38  ;;  %858 = vmatprep.mubr.msk.f32.mxu1 %vm29_vm0, %v685_v39 }
  0x2e   :  { %833 = vmatmul.mubr.msk.f32.gmra.mrb[14].mxu0 %vm29_vm0, %v669_v40  ;;  %859 = vmatmul.mubr.msk.f32.gmra.mrb[14].mxu1 %vm29_vm0, %v686_v41 }
  0xe5   :  { %v773_v42 = vpop.f32.mrb[0].mxu0  ;;  %v799_v43 = vpop.f32.mrb[0].mxu1 }
  0xe6   :  { %v302_v44 = vmax.f32 %v773_v42, %v799_v43  ;;  %v124_v45 = vpop.f32.mrb[1].mxu0  ;;  %v262_v46 = vpop.f32.mrb[1].mxu1 }
  0xe7   :  { %v301_v47 = vmax.f32 %v124_v45, %v262_v46 }
  0xe9   :  { %v776_v48 = vpop.f32.mrb[2].mxu0  ;;  %v802_v49 = vpop.f32.mrb[2].mxu1 }
  0xea   :  { %v304_v50 = vmax.f32 %v776_v48, %v802_v49  ;;  %v134_v51 = vpop.f32.mrb[3].mxu0  ;;  %v272_v52 = vpop.f32.mrb[3].mxu1 }
  0xeb   :  { %v303_v53 = vmax.f32 %v134_v51, %v272_v52 }
  0xed   :  { %v779_v54 = vpop.f32.mrb[4].mxu0  ;;  %v805_v55 = vpop.f32.mrb[4].mxu1 }
  0xee   :  { %v306_v56 = vmax.f32 %v779_v54, %v805_v55  ;;  %v144_v57 = vpop.f32.mrb[5].mxu0  ;;  %v282_v58 = vpop.f32.mrb[5].mxu1 }
  0xef   :  { %v305_v59 = vmax.f32 %v144_v57, %v282_v58 }
  0xf1   :  { %v782_v60 = vpop.f32.mrb[6].mxu0  ;;  %v808_v61 = vpop.f32.mrb[6].mxu1 }
  0xf2   :  { %v308_v62 = vmax.f32 %v782_v60, %v808_v61  ;;  %v154_v63 = vpop.f32.mrb[7].mxu0  ;;  %v292_v0 = vpop.f32.mrb[7].mxu1 }
  0xf3   :  { %v307_v1 = vmax.f32 %v154_v63, %v292_v0 }
  0xf5   :  { %v825_v2 = vpop.f32.mrb[8].mxu0  ;;  %v851_v3 = vpop.f32.mrb[8].mxu1 }
  0xf6   :  { %v448_v4 = vmax.f32 %v302_v44, %v825_v2  ;;  %v408_v5 = vpop.f32.mrb[9].mxu0  ;;  %v554_v6 = vpop.f32.mrb[9].mxu1 }
  0xf7   :  { %v447_v7 = vmax.f32 %v301_v47, %v408_v5 }
  0xf8   :  { %v594_v9 = vmax.f32 %v448_v4, %v851_v3 }
  0xf9   :  { %v593_v10 = vmax.f32 %v447_v7, %v554_v6  ;;  %v828_v11 = vpop.f32.mrb[10].mxu0  ;;  %v854_v12 = vpop.f32.mrb[10].mxu1 }
  0xfa   :  { %v609_v13 = vadd.f32 %v696_v8, %v594_v9  ;;  %v450_v14 = vmax.f32 %v304_v50, %v828_v11  ;;  %v418_v15 = vpop.f32.mrb[11].mxu0  ;;  %v564_v16 = vpop.f32.mrb[11].mxu1 }
  0xfb   :  { %v608_v17 = vadd.f32 %v696_v8, %v593_v10  ;;  %v449_v18 = vmax.f32 %v303_v53, %v418_v15 }
  0xfc   :  { %v617_v19 = vmax.f32 %v609_v13, 0.0  ;;  %v596_v20 = vmax.f32 %v450_v14, %v854_v12 }
  0xfd   :  { %v616_v21 = vmax.f32 %v608_v17, 0.0  ;;  %v595_v22 = vmax.f32 %v449_v18, %v564_v16  ;;  %v831_v23 = vpop.f32.mrb[12].mxu0  ;;  %v857_v24 = vpop.f32.mrb[12].mxu1 }
  0xfe   :  { %625 = vst [vmem:[%s1116_s3 + $0x8] sm:$0xff] %v617_v19  ;;  %v611_v25 = vadd.f32 %v696_v8, %v596_v20  ;;  %v452_v26 = vmax.f32 %v306_v56, %v831_v23  ;;  %v428_v27 = vpop.f32.mrb[13].mxu0  ;;  %v574_v28 = vpop.f32.mrb[13].mxu1 }
  0xff   :  { %624 = vst [vmem:[%s1116_s3] sm:$0xff] %v616_v21  ;;  %v610_v29 = vadd.f32 %v696_v8, %v595_v22  ;;  %v451_v30 = vmax.f32 %v305_v59, %v428_v27 }
 0x100   :  { %v619_v31 = vmax.f32 %v611_v25, 0.0  ;;  %v598_v32 = vmax.f32 %v452_v26, %v857_v24 }
 0x101   :  { %v618_v33 = vmax.f32 %v610_v29, 0.0  ;;  %v597_v34 = vmax.f32 %v451_v30, %v574_v28  ;;  %v834_v35 = vpop.f32.mrb[14].mxu0  ;;  %v860_v36 = vpop.f32.mrb[14].mxu1 }
 0x102   :  { %627 = vst [vmem:[%s1116_s3 + $0x18] sm:$0xff] %v619_v31  ;;  %v613_v37 = vadd.f32 %v696_v8, %v598_v32  ;;  %v454_v38 = vmax.f32 %v308_v62, %v834_v35  ;;  %v438_v39 = vpop.f32.mrb[15].mxu0  ;;  %v584_v40 = vpop.f32.mrb[15].mxu1 }
 0x103   :  { %626 = vst [vmem:[%s1116_s3 + $0x10] sm:$0xff] %v618_v33  ;;  %v612_v41 = vadd.f32 %v696_v8, %v597_v34  ;;  %v453_v42 = vmax.f32 %v307_v1, %v438_v39 }
 0x104   :  { %v621_v43 = vmax.f32 %v613_v37, 0.0  ;;  %v600_v44 = vmax.f32 %v454_v38, %v860_v36 }
 0x105   :  { %v620_v45 = vmax.f32 %v612_v41, 0.0  ;;  %v599_v46 = vmax.f32 %v453_v42, %v584_v40 }
 0x106   :  { %629 = vst [vmem:[%s1116_s3 + $0x28] sm:$0xff] %v621_v43  ;;  %v615_v47 = vadd.f32 %v696_v8, %v600_v44 }
 0x107   :  { %628 = vst [vmem:[%s1116_s3 + $0x20] sm:$0xff] %v620_v45  ;;  %v614_v48 = vadd.f32 %v696_v8, %v599_v46 }
 0x108   :  { %v623_v49 = vmax.f32 %v615_v47, 0.0 }
 0x109   :  { %v622_v50 = vmax.f32 %v614_v48, 0.0 }
 0x10a   :  { %631 = vst [vmem:[%s1116_s3 + $0x38] sm:$0xff] %v623_v49 }
 0x10b   :  { %630 = vst [vmem:[%s1116_s3 + $0x30] sm:$0xff] %v622_v50 }

// kernel: forward.5
= control target key start
LH: loop header
LB: loop body
LE: loop exit
PB: predicated region body
PF: predicated region fallthrough
CT: control target
= control target key end

     0   :  { %v753_v4 = vmov 0.0|0.0   ;;  %v754_v26 = vmov 1983009808   ;;  %v90_v28 = vlaneseq  ;;  %vm106_vm0 = vcmask 130048   ;;  %s1095_s0 = inlined_call_operand.vmem [shape: f32[2,400], index: 0, kind: input, shape index: {}]   ;;  %s1096_s1 = inlined_call_operand.vmem [shape: f32[400,128], index: 1, kind: input, shape index: {}]   ;;  %s1097_s2 = inlined_call_operand.vmem [shape: f32[1,128], index: 2, kind: input, shape index: {}]   ;;  %s1098_s3 = inlined_call_operand.vmem [shape: f32[128,128], index: 3, kind: input, shape index: {}]   ;;  %s1099_s4 = inlined_call_operand.vmem [shape: f32[1,128], index: 4, kind: input, shape index: {}]   ;;  %s1100_s5 = inlined_call_operand.vmem [shape: f32[128,128], index: 5, kind: input, shape index: {}]   ;;  %s1101_s6 = inlined_call_operand.vmem [shape: f32[1,128], index: 6, kind: input, shape index: {}]   ;;  %s1102_s7 = inlined_call_operand.hbm [shape: f32[2,128], index: 7, kind: output, shape index: {}]  }
   0x1   :  { %v44_v0 = vld [vmem:[%s1096_s1 + $0x80] sm:$0xff]  ;;  %v45_v1 = vld [vmem:[%s1096_s1 + $0x88] sm:$0xff]  ;;  %644 = vmatprep.subr.bf16.mxu1 %v753_v4  ;;  %v46_v10 = vld [vmem:[%s1096_s1 + $0x90] sm:$0xff]  ;;  %v88_v27 = vunpack.c.l.s4 %v754_v26 }
   0x2   :  { %v28_v2 = vld [vmem:[%s1096_s1] sm:$0xff]  ;;  %v612_v3 = vpack.c.bf16 %v45_v1, %v44_v0  ;;  %v29_v5 = vld [vmem:[%s1096_s1 + $0x8] sm:$0xff]  ;;  %v47_v11 = vld [vmem:[%s1096_s1 + $0x98] sm:$0xff]  ;;  %v91_v39 = vshrl.u32 %v90_v28, 7 }
   0x3   :  { %v60_v6 = vld [vmem:[%s1096_s1 + $0x100] sm:$0xff]  ;;  %v61_v7 = vld [vmem:[%s1096_s1 + $0x108] sm:$0xff]  ;;  %v614_v8 = vpack.c.bf16 %v29_v5, %v28_v2  ;;  %v30_v12 = vld [vmem:[%s1096_s1 + $0x10] sm:$0xff]  ;;  %v616_v13 = vpack.c.bf16 %v47_v11, %v46_v10  ;;  %v89_v38 = vunpack.c.0.s8 %v88_v27 }
   0x4   :  { %v645_v9 = vpack.c.bf16 %v61_v7, %v60_v6  ;;  %613 = vmatprep.subr.bf16.mxu0 %v612_v3  ;;  %v31_v14 = vld [vmem:[%s1096_s1 + $0x18] sm:$0xff]  ;;  %v62_v15 = vld [vmem:[%s1096_s1 + $0x110] sm:$0xff]  ;;  %v48_v19 = vld [vmem:[%s1096_s1 + $0xa0] sm:$0xff] }
   0x5   :  { %v63_v16 = vld [vmem:[%s1096_s1 + $0x118] sm:$0xff]  ;;  %615 = vmatpush3.bf16.msra.mxu0 %v614_v8  ;;  %v618_v17 = vpack.c.bf16 %v31_v14, %v30_v12  ;;  %v49_v20 = vld [vmem:[%s1096_s1 + $0xa8] sm:$0xff]  ;;  %v32_v21 = vld [vmem:[%s1096_s1 + $0x20] sm:$0xff]  ;;  %v92_v49 = vsub.s32 %v89_v38, %v91_v39 }
   0x6   :  { %646 = vmatpush1.bf16.msra.mxu1 %v645_v9  ;;  %v648_v18 = vpack.c.bf16 %v63_v16, %v62_v15  ;;  %617 = vmatprep.subr.bf16.mxu0 %v616_v13  ;;  %v620_v22 = vpack.c.bf16 %v49_v20, %v48_v19  ;;  %v33_v23 = vld [vmem:[%s1096_s1 + $0x28] sm:$0xff]  ;;  %v64_v24 = vld [vmem:[%s1096_s1 + $0x120] sm:$0xff]  ;;  %v50_v29 = vld [vmem:[%s1096_s1 + $0xb0] sm:$0xff] }
   0x7   :  { %647 = vmatprep.subr.bf16.mxu1 %v753_v4  ;;  %v65_v25 = vld [vmem:[%s1096_s1 + $0x128] sm:$0xff]  ;;  %v51_v30 = vld [vmem:[%s1096_s1 + $0xb8] sm:$0xff]  ;;  %v622_v31 = vpack.c.bf16 %v33_v23, %v32_v21  ;;  %v34_v33 = vld [vmem:[%s1096_s1 + $0x30] sm:$0xff] }
   0x8   :  { %v651_v32 = vpack.c.bf16 %v65_v25, %v64_v24  ;;  %v624_v34 = vpack.c.bf16 %v51_v30, %v50_v29  ;;  %v35_v35 = vld [vmem:[%s1096_s1 + $0x38] sm:$0xff]  ;;  %v66_v36 = vld [vmem:[%s1096_s1 + $0x130] sm:$0xff]  ;;  %v52_v40 = vld [vmem:[%s1096_s1 + $0xc0] sm:$0xff] }
   0x9   :  { %619 = vmatpush3.bf16.msra.mxu0 %v618_v17  ;;  %v67_v37 = vld [vmem:[%s1096_s1 + $0x138] sm:$0xff]  ;;  %v53_v41 = vld [vmem:[%s1096_s1 + $0xc8] sm:$0xff]  ;;  %v626_v42 = vpack.c.bf16 %v35_v35, %v34_v33  ;;  %v36_v44 = vld [vmem:[%s1096_s1 + $0x40] sm:$0xff] }
   0xa   :  { %649 = vmatpush1.bf16.msra.mxu1 %v648_v18  ;;  %621 = vmatprep.subr.bf16.mxu0 %v620_v22  ;;  %v654_v43 = vpack.c.bf16 %v67_v37, %v66_v36  ;;  %v628_v45 = vpack.c.bf16 %v53_v41, %v52_v40  ;;  %v37_v46 = vld [vmem:[%s1096_s1 + $0x48] sm:$0xff]  ;;  %v68_v47 = vld [vmem:[%s1096_s1 + $0x140] sm:$0xff]  ;;  %v54_v50 = vld [vmem:[%s1096_s1 + $0xd0] sm:$0xff] }
   0xb   :  { %650 = vmatprep.subr.bf16.mxu1 %v753_v4  ;;  %v69_v48 = vld [vmem:[%s1096_s1 + $0x148] sm:$0xff]  ;;  %v55_v51 = vld [vmem:[%s1096_s1 + $0xd8] sm:$0xff]  ;;  %v630_v52 = vpack.c.bf16 %v37_v46, %v36_v44  ;;  %v38_v54 = vld [vmem:[%s1096_s1 + $0x50] sm:$0xff] }
   0xc   :  { %v657_v53 = vpack.c.bf16 %v69_v48, %v68_v47  ;;  %v27_v55 = vld [vmem:[%s1095_s0] sm:$0xff]  ;;  %v632_v56 = vpack.c.bf16 %v55_v51, %v54_v50  ;;  %v39_v57 = vld [vmem:[%s1096_s1 + $0x58] sm:$0xff]  ;;  %v70_v58 = vld [vmem:[%s1096_s1 + $0x150] sm:$0xff] }
   0xd   :  { %623 = vmatpush3.bf16.msra.mxu0 %v622_v31  ;;  %v71_v59 = vld [vmem:[%s1096_s1 + $0x158] sm:$0xff]  ;;  %v86_v60 = vcombine.high %v27_v55, %v27_v55  ;;  %v93_v61 = vrot.slane %v27_v55, %v92_v49  ;;  %v56_v62 = vld [vmem:[%s1096_s1 + $0xe0] sm:$0xff]  ;;  %v57_v63 = vld [vmem:[%s1096_s1 + $0xe8] sm:$0xff]  ;;  %v634_v2 = vpack.c.bf16 %v39_v57, %v38_v54 }
   0xe   :  { %652 = vmatpush1.bf16.msra.mxu1 %v651_v32  ;;  %625 = vmatprep.subr.bf16.mxu0 %v624_v34  ;;  %v660_v3 = vpack.c.bf16 %v71_v59, %v70_v58  ;;  %v40_v5 = vld [vmem:[%s1096_s1 + $0x60] sm:$0xff]  ;;  %v41_v6 = vld [vmem:[%s1096_s1 + $0x68] sm:$0xff]  ;;  %v636_v7 = vpack.c.bf16 %v57_v63, %v56_v62 }
   0xf   :  { %653 = vmatprep.subr.bf16.mxu1 %v753_v4  ;;  %v101_v0 = vcombine.high %v93_v61, %v93_v61  ;;  %v100_v1 = vrot.slane %v86_v60, %v92_v49  ;;  %v72_v8 = vld [vmem:[%s1096_s1 + $0x160] sm:$0xff]  ;;  %v73_v9 = vld [vmem:[%s1096_s1 + $0x168] sm:$0xff] }
  0x11   :  { %627 = vmatpush3.bf16.msra.mxu0 %v626_v42  ;;  %v102_v10 = vcombine.high %v100_v1, %v100_v1 }
  0x12   :  { %655 = vmatpush1.bf16.msra.mxu1 %v654_v43  ;;  %629 = vmatprep.subr.bf16.mxu0 %v628_v45 }
  0x13   :  { %656 = vmatprep.subr.bf16.mxu1 %v753_v4 }
  0x15   :  { %631 = vmatpush3.bf16.msra.mxu0 %v630_v52 }
  0x16   :  { %658 = vmatpush1.bf16.msra.mxu1 %v657_v53  ;;  %633 = vmatprep.subr.bf16.mxu0 %v632_v56 }
  0x17   :  { %659 = vmatprep.subr.bf16.mxu1 %v753_v4 }
  0x18   :  { %12 = vsyncpa [#allocation3], 0  ;;  %v58_v11 = vld [vmem:[%s1096_s1 + $0xf0] sm:$0xff]  ;;  %v59_v12 = vld [vmem:[%s1096_s1 + $0xf8] sm:$0xff]  ;;  %173 = vmatprep.mubr.f32.mxu0 %v101_v0  ;;  %470 = vmatprep.mubr.msk.f32.mxu1 %vm106_vm0, %v102_v10  ;;  %v638_v13 = vpack.c.bf16 %v41_v6, %v40_v5  ;;  %v663_v14 = vpack.c.bf16 %v73_v9, %v72_v8  ;;  %vm755_vm1 = vmmov 0   ;;  %v756_v50 = vmov 0.0  }
  0x19   :  { %635 = vmatpush3.bf16.msra.mxu0 %v634_v2  ;;  %v42_v15 = vld [vmem:[%s1096_s1 + $0x70] sm:$0xff]  ;;  %v640_v16 = vpack.c.bf16 %v59_v12, %v58_v11  ;;  %v43_v17 = vld [vmem:[%s1096_s1 + $0x78] sm:$0xff]  ;;  %v76_v22 = vld [vmem:[%s1096_s1 + $0x180] sm:$0xff]  ;;  %vm441_vm3 = vcmask 1041408  }
  0x1a   :  { %661 = vmatpush1.bf16.msra.mxu1 %v660_v3  ;;  %637 = vmatprep.subr.bf16.mxu0 %v636_v7  ;;  %v74_v18 = vld [vmem:[%s1096_s1 + $0x170] sm:$0xff]  ;;  %v75_v19 = vld [vmem:[%s1096_s1 + $0x178] sm:$0xff]  ;;  %v642_v20 = vpack.c.bf16 %v43_v17, %v42_v15  ;;  %v77_v23 = vld [vmem:[%s1096_s1 + $0x188] sm:$0xff] }
  0x1b   :  { %662 = vmatprep.subr.bf16.mxu1 %v753_v4  ;;  %v666_v21 = vpack.c.bf16 %v75_v19, %v74_v18  ;;  %v250_v24 = vld [vmem:[%s1098_s3] sm:$0xff]  ;;  %v251_v25 = vld [vmem:[%s1098_s3 + $0x8] sm:$0xff]  ;;  %v669_v26 = vpack.c.bf16 %v77_v23, %v76_v22  ;;  %v252_v29 = vld [vmem:[%s1098_s3 + $0x10] sm:$0xff] }
  0x1c   :  { %v672_v27 = vpack.c.bf16 %v251_v25, %v250_v24  ;;  %v253_v30 = vld [vmem:[%s1098_s3 + $0x18] sm:$0xff]  ;;  %v254_v32 = vld [vmem:[%s1098_s3 + $0x20] sm:$0xff]  ;;  %v255_v33 = vld [vmem:[%s1098_s3 + $0x28] sm:$0xff]  ;;  %v438_v25 = vand.u32 127, %v90_v28 }
  0x1d   :  { %639 = vmatpush3.bf16.msra.mxu0 %v638_v13  ;;  %v675_v31 = vpack.c.bf16 %v253_v30, %v252_v29  ;;  %v678_v34 = vpack.c.bf16 %v255_v33, %v254_v32  ;;  %v256_v35 = vld [vmem:[%s1098_s3 + $0x30] sm:$0xff]  ;;  %v257_v36 = vld [vmem:[%s1098_s3 + $0x38] sm:$0xff]  ;;  %v258_v38 = vld [vmem:[%s1098_s3 + $0x40] sm:$0xff] }
  0x1e   :  { %664 = vmatpush1.bf16.msra.mxu1 %v663_v14  ;;  %641 = vmatprep.subr.bf16.mxu0 %v640_v16  ;;  %v681_v37 = vpack.c.bf16 %v257_v36, %v256_v35  ;;  %v259_v39 = vld [vmem:[%s1098_s3 + $0x48] sm:$0xff]  ;;  %v260_v41 = vld [vmem:[%s1098_s3 + $0x50] sm:$0xff]  ;;  %v261_v42 = vld [vmem:[%s1098_s3 + $0x58] sm:$0xff]  ;;  %vm439_vm2 = vcmp.lt.s32.totalorder %v438_v25, 10 }
  0x1f   :  { %665 = vmatprep.subr.bf16.mxu1 %v753_v4  ;;  %v684_v40 = vpack.c.bf16 %v259_v39, %v258_v38  ;;  %v687_v43 = vpack.c.bf16 %v261_v42, %v260_v41  ;;  %v262_v44 = vld [vmem:[%s1098_s3 + $0x60] sm:$0xff]  ;;  %v263_v45 = vld [vmem:[%s1098_s3 + $0x68] sm:$0xff]  ;;  %v264_v47 = vld [vmem:[%s1098_s3 + $0x70] sm:$0xff] }
  0x20   :  { %v690_v46 = vpack.c.bf16 %v263_v45, %v262_v44  ;;  %v265_v48 = vld [vmem:[%s1098_s3 + $0x78] sm:$0xff]  ;;  %v344_v51 = vld [vmem:[%s1100_s5] sm:$0xff]  ;;  %v345_v52 = vld [vmem:[%s1100_s5 + $0x8] sm:$0xff] }
  0x21   :  { %643 = vmatpush3.bf16.msra.mxu0 %v642_v20  ;;  %v693_v49 = vpack.c.bf16 %v265_v48, %v264_v47  ;;  %v346_v53 = vld [vmem:[%s1100_s5 + $0x10] sm:$0xff]  ;;  %v696_v54 = vpack.c.bf16 %v345_v52, %v344_v51  ;;  %v347_v55 = vld [vmem:[%s1100_s5 + $0x18] sm:$0xff]  ;;  %v348_v57 = vld [vmem:[%s1100_s5 + $0x20] sm:$0xff] }
  0x22   :  { %667 = vmatpush1.bf16.msra.mxu1 %v666_v21  ;;  %671 = vmatprep.subr.bf16.mxu0 %v753_v4  ;;  %v699_v56 = vpack.c.bf16 %v347_v55, %v346_v53  ;;  %v349_v58 = vld [vmem:[%s1100_s5 + $0x28] sm:$0xff]  ;;  %v350_v60 = vld [vmem:[%s1100_s5 + $0x30] sm:$0xff]  ;;  %v352_v63 = vld [vmem:[%s1100_s5 + $0x40] sm:$0xff] }
  0x23   :  { %668 = vmatprep.subr.bf16.mxu1 %v753_v4  ;;  %v702_v59 = vpack.c.bf16 %v349_v58, %v348_v57  ;;  %v353_v0 = vld [vmem:[%s1100_s5 + $0x48] sm:$0xff]  ;;  %v354_v2 = vld [vmem:[%s1100_s5 + $0x50] sm:$0xff]  ;;  %v355_v3 = vld [vmem:[%s1100_s5 + $0x58] sm:$0xff] }
  0x24   :  { %174 = vmatmul.mubr.f32.vlgmr.msra.gmra.mrb[0].mxu0 %v93_v61  ;;  %v351_v61 = vld [vmem:[%s1100_s5 + $0x38] sm:$0xff]  ;;  %v711_v5 = vpack.c.bf16 %v355_v3, %v354_v2  ;;  %v356_v6 = vld [vmem:[%s1100_s5 + $0x60] sm:$0xff]  ;;  %v357_v7 = vld [vmem:[%s1100_s5 + $0x68] sm:$0xff] }
  0x25   :  { %673 = vmatpush3.bf16.msra.mxu0 %v672_v27  ;;  %574 = vmatprep.mubr.msk.f32.mxu0 %vm755_vm1, %v756_v50  ;;  %v705_v62 = vpack.c.bf16 %v351_v61, %v350_v60  ;;  %v714_v8 = vpack.c.bf16 %v357_v7, %v356_v6  ;;  %v469_v11 = vld [vmem:[%s1097_s2] ss:$0 sm:$0xff]  ;;  %v358_v18 = vld [vmem:[%s1100_s5 + $0x70] sm:$0xff] }
  0x26   :  { %670 = vmatpush1.bf16.msra.mxu1 %v669_v26  ;;  %674 = vmatprep.subr.bf16.mxu0 %v753_v4  ;;  %v471_v20 = vld [vmem:[%s1099_s4] ss:$0 sm:$0xff]  ;;  %s757_s4 = smov [#allocation2]  }
  0x27   :  { %695 = vmatprep.subr.bf16.mxu1 %v753_v4  ;;  %v472_v26 = vld [vmem:[%s1101_s6] ss:$0 sm:$0xff] }
  0x29   :  { %244 = vmatmul.mubr.f32.vlgmr.msra.gmra.mrb[0].mxu1 %v100_v1  ;;  %676 = vmatpush3.bf16.msra.mxu0 %v675_v31  ;;  %v708_v1 = vpack.c.bf16 %v353_v0, %v352_v63 }
  0x2a   :  { %677 = vmatprep.subr.bf16.mxu0 %v753_v4  ;;  %609 = vmatprep.mubr.msk.f32.mxu1 %vm755_vm1, %v756_v50 }
  0x2b   :  { %697 = vmatpush3.bf16.msra.mxu1 %v696_v54 }
  0x2c   :  { %698 = vmatprep.subr.bf16.mxu1 %v753_v4 }
  0x2d   :  { %679 = vmatpush3.bf16.msra.mxu0 %v678_v34 }
  0x2e   :  { %680 = vmatprep.subr.bf16.mxu0 %v753_v4 }
  0x2f   :  { %700 = vmatpush3.bf16.msra.mxu1 %v699_v56 }
  0x30   :  { %701 = vmatprep.subr.bf16.mxu1 %v753_v4 }
  0x31   :  { %682 = vmatpush3.bf16.msra.mxu0 %v681_v37 }
  0x32   :  { %683 = vmatprep.subr.bf16.mxu0 %v753_v4 }
  0x33   :  { %703 = vmatpush3.bf16.msra.mxu1 %v702_v59 }
  0x34   :  { %704 = vmatprep.subr.bf16.mxu1 %v753_v4 }
  0x35   :  { %685 = vmatpush3.bf16.msra.mxu0 %v684_v40 }
  0x36   :  { %686 = vmatprep.subr.bf16.mxu0 %v753_v4 }
  0x37   :  { %706 = vmatpush3.bf16.msra.mxu1 %v705_v62 }
  0x38   :  { %707 = vmatprep.subr.bf16.mxu1 %v753_v4 }
  0x39   :  { %688 = vmatpush3.bf16.msra.mxu0 %v687_v43 }
  0x3a   :  { %689 = vmatprep.subr.bf16.mxu0 %v753_v4 }
  0x3b   :  { %709 = vmatpush3.bf16.msra.mxu1 %v708_v1 }
  0x3c   :  { %710 = vmatprep.subr.bf16.mxu1 %v753_v4 }
  0x3d   :  { %691 = vmatpush3.bf16.msra.mxu0 %v690_v46 }
  0x3e   :  { %692 = vmatprep.subr.bf16.mxu0 %v753_v4 }
  0x3f   :  { %712 = vmatpush3.bf16.msra.mxu1 %v711_v5 }
  0x40   :  { %713 = vmatprep.subr.bf16.mxu1 %v753_v4 }
  0x41   :  { %694 = vmatpush3.bf16.msra.mxu0 %v693_v49 }
  0x43   :  { %715 = vmatpush3.bf16.msra.mxu1 %v714_v8 }
  0x44   :  { %716 = vmatprep.subr.bf16.mxu1 %v753_v4  ;;  %v359_v4 = vld [vmem:[%s1100_s5 + $0x78] sm:$0xff]  ;;  %s461_s5 = sshll.u32 %s757_s4, 4  ;;  %s462_s5 = int_to_ptr.vmem [resolvable:$true] %s461_s5 }
  0x45   :  { %v717_v19 = vpack.c.bf16 %v359_v4, %v358_v18  ;;  %s729_s6 = scalar_lea.vmem %s462_s5, 32  ;;  %p734_p1 = scmp.lt.s32.totalorder %s462_s5, %s462_s5 }
  0x46   :  { %p730_p0 = scmp.ne.s32.totalorder %s462_s5, %s729_s6  ;;  %p735_p2 = scmp.lt.s32.totalorder %s729_s6, %s729_s6 }
  0x47   :  { %718 = vmatpush3.bf16.msra.mxu1 %v717_v19 }
  0x48   :  { %p736_p3 = por %p735_p2, %p734_p1 }
  0x4a   :  { %p737_p4 = pnand %p736_p3, %p730_p0 }
  0xf7   :  { %v505_v9 = vpop.f32.mrb[0].mxu0 }
  0xf8   :  { %v506_v10 = vpop.f32.mrb[1].mxu0 }
  0xf9   :  { %v507_v12 = vadd.f32 %v506_v10, %v505_v9 }
  0xfb   :  { %v176_v13 = vadd.f32 %v507_v12, %v469_v11 }
  0xfc   :  { %v245_v14 = vpop.f32.mrb[0].mxu1 }
  0xfd   :  { %v247_v15 = vpop.f32.mrb[1].mxu1  ;;  %v246_v16 = vadd.f32 %v245_v14, %v176_v13 }
  0xff   :  { %v249_v17 = vmax.f32 %v246_v16, 0.0 }
 0x101   :  { %575 = vmatmul.mubr.f32.vlgmr.msra.gmra.mrb[2].mxu0 %v249_v17 }
 0x1d4   :  { %v339_v21 = vpop.f32.mrb[2].mxu0 }
 0x1d5   :  { %v340_v22 = vadd.f32 %v471_v20, %v339_v21  ;;  %v576_v23 = vpop.f32.mrb[3].mxu0 }
 0x1d7   :  { %v343_v24 = vmax.f32 %v340_v22, 0.0 }
 0x1d9   :  { %610 = vmatmul.mubr.f32.vlgmr.msra.gmra.mrb[2].mxu1 %v343_v24 }
 0x2ac   :  { %v433_v27 = vpop.f32.mrb[2].mxu1 }
 0x2ad   :  { %v434_v29 = vadd.f32 %v472_v26, %v433_v27  ;;  %v611_v30 = vpop.f32.mrb[3].mxu1 }
 0x2af   :  { %v440_v31 = vsel %vm439_vm2, %v434_v29, -1e+30 }
 0x2b0   :  { %v442_v32 = vsel %vm441_vm3, %v440_v31, -inf }
 0x2b1   :  { %443 = vmax.xlane.f32.xlu0 %v442_v32 }
 0x33e   :  { %v444_v33 = vpop.xlane.xlu0 %443 }
 0x33f   :  { %v445_v34 = vsub.f32 %v440_v31, %v444_v33 }
 0x341   :  { %v446_v35 = vmul.f32 1.442695, %v445_v34 }
 0x343   :  { %725 = vpow2.f32 %v446_v35 }
 0x34d   :  { %v726_v36 = vpop.eup %725 }
 0x34e   :  { %v448_v37 = vsel %vm441_vm3, %v726_v36, 0.0 }
 0x34f   :  { %449 = vadd.xlane.f32.xlu0 %v448_v37 }
 0x3dc   :  { %v450_v28 = vpop.xlane.xlu0 %449 }
 0x3dd   :  { %727 = vlog2.f32 %v450_v28 }
 0x3e7   :  { %v728_v38 = vpop.eup %727 }
 0x3e8   :  { %v452_v39 = vmul.f32 0.6931472, %v728_v38 }
 0x3ea   :  { %v453_v40 = vsub.f32 %v445_v34, %v452_v39 }
 0x3ec   :  { %454 = vst [vmem:[#allocation2] sm:$0x3] %v453_v40 }
 0x3ed   :  { %740 = shalt.err (!%p737_p4)
}
 0x3ee   :  { %s741_s27 = scalar_lea.hbm %s1102_s7, 32 }
 0x3ef   :  { %p742_p5 = scmp.ne.s32.totalorder %s1102_s7, %s741_s27  ;;  %p745_p6 = scmp.lt.u32.totalorder %s741_s27, %s1102_s7 }
 0x3f1   :  { %p747_p7 = pnand %p745_p6, %p742_p5 }
 0x3f3   :  { %750 = shalt.err (!%p747_p7)
}
 0x3f4   :  { %464 = dma.vmem_to_hbm [thread:$0]  %s462_s5, 32, %s1102_s7, [#allocation3]  }
 0x3f5   :  { %751 = dma.done.wait [#allocation3], 32  }
 0x3f6   :  { %752 = vsyncadd [#allocation3], 4294967264 }
 0x3f7   :  { %468 = vsyncpa [#allocation3], 1 }

</bundles_post_ra>
